<compile_context>
chip_gen: v7x
topology: tpu7x:2x2x1
jax: 0.10.0
libtpu: 0.0.40
codegen_flags: <defaults>
</compile_context>

<pallas_src>
import math

import jax
import jax.numpy as jnp
from jax.experimental import pallas as pl
from jax.experimental.pallas import tpu as pltpu

# ---------------- model config (small GPT-2 style block) ----------------------
B = 2            # batch
S = 8            # sequence length
D = 32           # hidden size (real)
H = 4            # attention heads
HD = D // H      # head dim
FF = 4 * D       # MLP inner dim (= 128)
N_LAYERS = 2
LN_EPS = 1e-5

DP = 128         # lane-padded hidden size (lane-dense last dim)
NTOK = B * S     # tokens processed per call
NEG_INF = -1e30
ATTN_SCALE = 1.0 / math.sqrt(HD)   # folded into the packed Q projection

# rows of the packed per-layer vector slab (each row is DP lanes, zero padded)
ROW_LN1_W, ROW_LN1_B, ROW_LN2_W, ROW_LN2_B = 0, 1, 2, 3
ROW_BQ, ROW_BK, ROW_BV, ROW_BO, ROW_BFC, ROW_BPROJ = 4, 5, 6, 7, 8, 9
N_VEC_ROWS = 10


# ------------------------------- Pallas kernel --------------------------------
def gpt2_stack_kernel(x_ref, vec_ref, wqkv_ref, wo_ref, wfc_ref, wproj_ref, o_ref):
    """All N_LAYERS GPT-2 blocks for all tokens, fully VMEM-resident.

    x_ref/o_ref : (NTOK, DP)            f32, pad lanes (>= D) are zero
    vec_ref     : (L, N_VEC_ROWS, DP)   packed LN gains/biases + biases
    wqkv_ref    : (L, DP, 3*DP)         q/k/v weights, each in its own 128-lane
                                        slot; q already scaled by 1/sqrt(HD)
    wo_ref      : (L, H, HD, DP)        per-head output projection (cols >= D zero)
    wfc_ref     : (L, DP, FF)
    wproj_ref   : (L, FF, DP)           cols >= D zero
    """
    x = x_ref[...].astype(jnp.float32)                       # (NTOK, DP)

    # ---- constants hoisted out of the per-layer loop -------------------------
    qpos = jax.lax.broadcasted_iota(jnp.int32, (1, S, S), 1)
    kpos = jax.lax.broadcasted_iota(jnp.int32, (1, S, S), 2)
    mask_bias = jnp.where(qpos >= kpos, 0.0, NEG_INF).astype(jnp.float32)  # (1,S,S)
    inv_d = 1.0 / D

    def layernorm(h, w, b):
        # Single-pass statistics over the D real features: pad lanes of h are
        # zero, so full-lane sums equal the real-feature sums.  w and b are
        # zero-padded, so the output pad lanes stay exactly zero.
        mu = jnp.sum(h, axis=-1, keepdims=True) * inv_d
        m2 = jnp.sum(h * h, axis=-1, keepdims=True) * inv_d
        var = m2 - mu * mu
        return (h - mu) * jax.lax.rsqrt(var + LN_EPS) * w + b

    def split_heads(z):
        # (NTOK, D) -> (H*B, S, HD) with g = h*B + b.  Only tile-aligned
        # leading-dim splits and major-axis concat (no lane-dim reshapes).
        parts = [z[:, hh * HD:(hh + 1) * HD].reshape(B, S, HD) for hh in range(H)]
        return jnp.concatenate(parts, axis=0)

    for l in range(N_LAYERS):          # static unroll; all weights stay in VMEM
        vec = vec_ref[l]               # (N_VEC_ROWS, DP)
        wqkv = wqkv_ref[l]             # (DP, 3*DP)
        wo = wo_ref[l]                 # (H, HD, DP)
        wfc = wfc_ref[l]               # (DP, FF)
        wproj = wproj_ref[l]           # (FF, DP)

        # ---------------- attention sub-block (pre-LN) ------------------------
        h1 = layernorm(x, vec[ROW_LN1_W:ROW_LN1_W + 1], vec[ROW_LN1_B:ROW_LN1_B + 1])
        qkv = jnp.dot(h1, wqkv, preferred_element_type=jnp.float32)   # (NTOK, 3*DP)

        q = split_heads(qkv[:, 0 * DP:0 * DP + D] + vec[ROW_BQ:ROW_BQ + 1, :D])
        k = split_heads(qkv[:, 1 * DP:1 * DP + D] + vec[ROW_BK:ROW_BK + 1, :D])
        v = split_heads(qkv[:, 2 * DP:2 * DP + D] + vec[ROW_BV:ROW_BV + 1, :D])

        # one batched contraction over all (head, batch) pairs; score scale is
        # already folded into the Q weights, causal mask is a hoisted add.
        s = jnp.einsum("gqe,gke->gqk", q, k,
                       preferred_element_type=jnp.float32) + mask_bias   # (H*B,S,S)
        m = jnp.max(s, axis=-1, keepdims=True)
        e = jnp.exp(s - m)
        p = e * (1.0 / jnp.sum(e, axis=-1, keepdims=True))              # stable softmax
        a = jnp.einsum("gqk,gke->gqe", p, v,
                       preferred_element_type=jnp.float32)              # (H*B, S, HD)

        # output projection as a sum over heads (no lane-axis concat)
        attn = jnp.dot(a[0:B].reshape(NTOK, HD), wo[0],
                       preferred_element_type=jnp.float32)
        for hh in range(1, H):
            a_h = a[hh * B:(hh + 1) * B].reshape(NTOK, HD)
            attn = attn + jnp.dot(a_h, wo[hh], preferred_element_type=jnp.float32)
        x = x + attn + vec[ROW_BO:ROW_BO + 1]

        # ---------------- MLP sub-block (pre-LN) ------------------------------
        h2 = layernorm(x, vec[ROW_LN2_W:ROW_LN2_W + 1], vec[ROW_LN2_B:ROW_LN2_B + 1])
        ff = jnp.dot(h2, wfc, preferred_element_type=jnp.float32) + vec[ROW_BFC:ROW_BFC + 1]
        ff = jax.nn.gelu(ff, approximate=True)                # GPT-2 tanh gelu
        x = x + jnp.dot(ff, wproj, preferred_element_type=jnp.float32) \
              + vec[ROW_BPROJ:ROW_BPROJ + 1]

    o_ref[...] = x.astype(o_ref.dtype)


# ------------------------------ parameter packing ------------------------------
def pack_layer_params(layer_params):
    """Stack per-layer params on a leading axis and zero-pad to lane-dense DP.

    The 1/sqrt(HD) attention-score scale is folded into the Q projection and
    Q bias here (one-time weight transform), so the kernel never multiplies by
    it at runtime.
    """
    vec_l, wqkv_l, wo_l, wfc_l, wproj_l = [], [], [], [], []

    def pad_row(v):
        v = jnp.ravel(v).astype(jnp.float32)
        return jnp.zeros((DP,), jnp.float32).at[: v.shape[0]].set(v)

    for (ln1_w, ln1_b, wqkv, bqkv, wo, bo, ln2_w, ln2_b,
         wfc, bfc, wproj, bproj) in layer_params:
        wqkv = wqkv.astype(jnp.float32)
        bqkv_f = jnp.ravel(bqkv).astype(jnp.float32)

        bq = bqkv_f[0:D] * ATTN_SCALE
        bk = bqkv_f[D:2 * D]
        bv = bqkv_f[2 * D:3 * D]
        vec = jnp.stack([
            pad_row(ln1_w), pad_row(ln1_b), pad_row(ln2_w), pad_row(ln2_b),
            pad_row(bq), pad_row(bk), pad_row(bv),
            pad_row(bo), pad_row(bfc), pad_row(bproj),
        ])                                                    # (N_VEC_ROWS, DP)

        wq = wqkv[:, 0:D] * ATTN_SCALE                        # scale folded in
        wk = wqkv[:, D:2 * D]
        wv = wqkv[:, 2 * D:3 * D]
        wqkv_p = jnp.zeros((DP, 3 * DP), jnp.float32)         # q/k/v each in own slot
        wqkv_p = wqkv_p.at[:D, 0 * DP:0 * DP + D].set(wq)
        wqkv_p = wqkv_p.at[:D, 1 * DP:1 * DP + D].set(wk)
        wqkv_p = wqkv_p.at[:D, 2 * DP:2 * DP + D].set(wv)

        wo_heads = jnp.zeros((H, HD, DP), jnp.float32).at[:, :, :D].set(
            wo.astype(jnp.float32).reshape(H, HD, D))
        wfc_p = jnp.zeros((DP, FF), jnp.float32).at[:D, :].set(wfc.astype(jnp.float32))
        wproj_p = jnp.zeros((FF, DP), jnp.float32).at[:, :D].set(wproj.astype(jnp.float32))

        vec_l.append(vec); wqkv_l.append(wqkv_p); wo_l.append(wo_heads)
        wfc_l.append(wfc_p); wproj_l.append(wproj_p)

    return (jnp.stack(vec_l), jnp.stack(wqkv_l), jnp.stack(wo_l),
            jnp.stack(wfc_l), jnp.stack(wproj_l))


# -------------------------------- wrapper --------------------------------------
def hf_block_sequence(x, layer_params):
    """HFBlockSequence.forward: x = layer(x)[0] for each layer — fully fused."""
    b, s, d = x.shape
    assert (b, s, d) == (B, S, D)
    vec_all, wqkv_all, wo_all, wfc_all, wproj_all = pack_layer_params(layer_params)

    # lane-dense, zero-padded activations: (B*S, 128)
    x_p = jnp.zeros((NTOK, DP), x.dtype).at[:, :D].set(x.reshape(NTOK, D))

    vmem = lambda: pl.BlockSpec(memory_space=pltpu.MemorySpace.VMEM)
    out = pl.pallas_call(
        gpt2_stack_kernel,
        out_shape=jax.ShapeDtypeStruct((NTOK, DP), x.dtype),
        in_specs=[vmem() for _ in range(6)],
        out_specs=vmem(),
    )(x_p, vec_all, wqkv_all, wo_all, wfc_all, wproj_all)

    return out[:, :D].reshape(B, S, D)


# ----------------------------- pure-JAX reference ------------------------------
def ref_block(x, params):
    (ln1_w, ln1_b, wqkv, bqkv, wo, bo, ln2_w, ln2_b, wfc, bfc, wproj, bproj) = params

    def layernorm(h, w, b):
        mu = jnp.mean(h, axis=-1, keepdims=True)
        var = jnp.mean((h - mu) ** 2, axis=-1, keepdims=True)
        return (h - mu) * jax.lax.rsqrt(var + LN_EPS) * w + b

    h = layernorm(x, ln1_w, ln1_b)
    qkv = h @ wqkv + bqkv
    q, k, v = jnp.split(qkv, 3, axis=-1)
    q = q.reshape(B, S, H, HD).transpose(0, 2, 1, 3)
    k = k.reshape(B, S, H, HD).transpose(0, 2, 1, 3)
    v = v.reshape(B, S, H, HD).transpose(0, 2, 1, 3)
    s = jnp.einsum("bhqd,bhkd->bhqk", q, k) / math.sqrt(HD)
    mask = jnp.tril(jnp.ones((S, S), bool))
    s = jnp.where(mask, s, NEG_INF)
    p = jax.nn.softmax(s, axis=-1)
    a = jnp.einsum("bhqk,bhkd->bhqd", p, v).transpose(0, 2, 1, 3).reshape(B, S, D)
    x = x + a @ wo + bo
    h2 = layernorm(x, ln2_w, ln2_b)
    ff = jax.nn.gelu(h2 @ wfc + bfc, approximate=True) @ wproj + bproj
    return x + ff


def ref_sequence(x, layer_params):
    for p in layer_params:
        x = ref_block(x, p)
    return x


# ----------------------------- parameter init ----------------------------------
def init_layer_params(key):
    ks = jax.random.split(key, 4)
    scale = 0.02
    ln1_w = jnp.ones((1, D), jnp.float32)
    ln1_b = jnp.zeros((1, D), jnp.float32)
    wqkv = scale * jax.random.normal(ks[0], (D, 3 * D), jnp.float32)
    bqkv = jnp.zeros((1, 3 * D), jnp.float32)
    wo = scale * jax.random.normal(ks[1], (D, D), jnp.float32)
    bo = jnp.zeros((1, D), jnp.float32)
    ln2_w = jnp.ones((1, D), jnp.float32)
    ln2_b = jnp.zeros((1, D), jnp.float32)
    wfc = scale * jax.random.normal(ks[2], (D, FF), jnp.float32)
    bfc = jnp.zeros((1, FF), jnp.float32)
    wproj = scale * jax.random.normal(ks[3], (FF, D), jnp.float32)
    bproj = jnp.zeros((1, D), jnp.float32)
    return (ln1_w, ln1_b, wqkv, bqkv, wo, bo,
            ln2_w, ln2_b, wfc, bfc, wproj, bproj)


if __name__ == "__main__":
    key = jax.random.PRNGKey(0)
    kx, *layer_keys = jax.random.split(key, N_LAYERS + 1)
    x = jax.random.normal(kx, (B, S, D), jnp.float32)
    layer_params = [init_layer_params(k) for k in layer_keys]

    out = hf_block_sequence(x, layer_params)
    out = jax.block_until_ready(out)

    ref = ref_sequence(x, layer_params)
    assert out.shape == (B, S, D)
    assert jnp.allclose(out, ref, atol=1e-4, rtol=1e-4), "mismatch vs JAX reference"
    print("KERNEL_OK")
</pallas_src>

<mosaic_0001>
module attributes {stable_mosaic.version = 11 : i64} {
  func.func @gpt2_stack_kernel(%arg0: memref<16x128xf32, #tpu.memory_space<vmem>>, %arg1: memref<2x10x128xf32, #tpu.memory_space<vmem>>, %arg2: memref<2x128x384xf32, #tpu.memory_space<vmem>>, %arg3: memref<2x4x8x128xf32, #tpu.memory_space<vmem>>, %arg4: memref<2x128x128xf32, #tpu.memory_space<vmem>>, %arg5: memref<2x128x128xf32, #tpu.memory_space<vmem>>, %arg6: memref<16x128xf32, #tpu.memory_space<vmem>>) attributes {dimension_semantics = [], scalar_prefetch = 0 : i64, scratch_operands = 0 : i64, tpu.core_type = #tpu.core_type<tc>} {
    %c0 = arith.constant 0 : index
    %c0_0 = arith.constant 0 : index
    %0 = vector.load %arg0[%c0, %c0_0] : memref<16x128xf32, #tpu.memory_space<vmem>>, vector<16x128xf32>
    %1 = tpu.iota {dimensions = array<i32: 1>} : vector<1x8x8xi32>
    %2 = tpu.iota {dimensions = array<i32: 2>} : vector<1x8x8xi32>
    %3 = arith.cmpi sge, %1, %2 : vector<1x8x8xi32>
    %cst = arith.constant 0.000000e+00 : f32
    %cst_1 = arith.constant -1.000000e+30 : f32
    %4 = vector.broadcast %cst : f32 to vector<1x8x8xf32>
    %5 = vector.broadcast %cst_1 : f32 to vector<1x8x8xf32>
    %6 = arith.select %3, %4, %5 : vector<1x8x8xi1>, vector<1x8x8xf32>
    %c0_2 = arith.constant 0 : index
    %c0_3 = arith.constant 0 : index
    %c0_4 = arith.constant 0 : index
    %7 = vector.load %arg1[%c0_2, %c0_3, %c0_4] : memref<2x10x128xf32, #tpu.memory_space<vmem>>, vector<1x10x128xf32>
    %8 = vector.shape_cast %7 : vector<1x10x128xf32> to vector<10x128xf32>
    %c0_5 = arith.constant 0 : index
    %c0_6 = arith.constant 0 : index
    %c0_7 = arith.constant 0 : index
    %9 = vector.load %arg2[%c0_5, %c0_6, %c0_7] : memref<2x128x384xf32, #tpu.memory_space<vmem>>, vector<1x128x384xf32>
    %10 = vector.shape_cast %9 : vector<1x128x384xf32> to vector<128x384xf32>
    %c0_8 = arith.constant 0 : index
    %c0_9 = arith.constant 0 : index
    %c0_10 = arith.constant 0 : index
    %c0_11 = arith.constant 0 : index
    %11 = vector.load %arg3[%c0_8, %c0_9, %c0_10, %c0_11] : memref<2x4x8x128xf32, #tpu.memory_space<vmem>>, vector<1x4x8x128xf32>
    %12 = vector.shape_cast %11 : vector<1x4x8x128xf32> to vector<4x8x128xf32>
    %c0_12 = arith.constant 0 : index
    %c0_13 = arith.constant 0 : index
    %c0_14 = arith.constant 0 : index
    %13 = vector.load %arg4[%c0_12, %c0_13, %c0_14] : memref<2x128x128xf32, #tpu.memory_space<vmem>>, vector<1x128x128xf32>
    %14 = vector.shape_cast %13 : vector<1x128x128xf32> to vector<128x128xf32>
    %c0_15 = arith.constant 0 : index
    %c0_16 = arith.constant 0 : index
    %c0_17 = arith.constant 0 : index
    %15 = vector.load %arg5[%c0_15, %c0_16, %c0_17] : memref<2x128x128xf32, #tpu.memory_space<vmem>>, vector<1x128x128xf32>
    %16 = vector.shape_cast %15 : vector<1x128x128xf32> to vector<128x128xf32>
    %17 = vector.extract_strided_slice %8 {offsets = [0, 0], sizes = [1, 128], strides = [1, 1]} : vector<10x128xf32> to vector<1x128xf32>
    %18 = vector.extract_strided_slice %8 {offsets = [1, 0], sizes = [1, 128], strides = [1, 1]} : vector<10x128xf32> to vector<1x128xf32>
    %cst_18 = arith.constant dense<0.000000e+00> : vector<16xf32>
    %19 = vector.multi_reduction <add>, %0, %cst_18 [1] : vector<16x128xf32> to vector<16xf32>
    %20 = vector.shape_cast %19 : vector<16xf32> to vector<16x1xf32>
    %cst_19 = arith.constant 3.125000e-02 : f32
    %21 = vector.broadcast %cst_19 : f32 to vector<16x1xf32>
    %22 = arith.mulf %20, %21 : vector<16x1xf32>
    %23 = arith.mulf %0, %0 : vector<16x128xf32>
    %cst_20 = arith.constant dense<0.000000e+00> : vector<16xf32>
    %24 = vector.multi_reduction <add>, %23, %cst_20 [1] : vector<16x128xf32> to vector<16xf32>
    %25 = vector.shape_cast %24 : vector<16xf32> to vector<16x1xf32>
    %cst_21 = arith.constant 3.125000e-02 : f32
    %26 = vector.broadcast %cst_21 : f32 to vector<16x1xf32>
    %27 = arith.mulf %25, %26 : vector<16x1xf32>
    %28 = arith.mulf %22, %22 : vector<16x1xf32>
    %29 = arith.subf %27, %28 : vector<16x1xf32>
    %30 = vector.broadcast %22 : vector<16x1xf32> to vector<16x128xf32>
    %31 = arith.subf %0, %30 : vector<16x128xf32>
    %cst_22 = arith.constant 9.99999974E-6 : f32
    %32 = vector.broadcast %cst_22 : f32 to vector<16x1xf32>
    %33 = arith.addf %29, %32 : vector<16x1xf32>
    %34 = math.rsqrt %33 : vector<16x1xf32>
    %35 = vector.broadcast %34 : vector<16x1xf32> to vector<16x128xf32>
    %36 = arith.mulf %31, %35 : vector<16x128xf32>
    %37 = vector.broadcast %17 : vector<1x128xf32> to vector<16x128xf32>
    %38 = arith.mulf %36, %37 : vector<16x128xf32>
    %39 = vector.broadcast %18 : vector<1x128xf32> to vector<16x128xf32>
    %40 = arith.addf %38, %39 : vector<16x128xf32>
    %cst_23 = arith.constant dense<0.000000e+00> : vector<16x384xf32>
    %41 = tpu.matmul %40, %10, %cst_23 {dimension_numbers = #tpu.dot_dimension_numbers<[1], [0], [0], [1], [0, 0, 1, 1], [], []>} : vector<16x128xf32>, vector<128x384xf32>, vector<16x384xf32> -> vector<16x384xf32>
    %42 = vector.extract_strided_slice %41 {offsets = [0, 0], sizes = [16, 32], strides = [1, 1]} : vector<16x384xf32> to vector<16x32xf32>
    %43 = vector.extract_strided_slice %8 {offsets = [4, 0], sizes = [1, 32], strides = [1, 1]} : vector<10x128xf32> to vector<1x32xf32>
    %44 = vector.broadcast %43 : vector<1x32xf32> to vector<16x32xf32>
    %45 = arith.addf %42, %44 : vector<16x32xf32>
    %46 = vector.extract_strided_slice %45 {offsets = [0, 0], sizes = [16, 8], strides = [1, 1]} : vector<16x32xf32> to vector<16x8xf32>
    %47 = vector.shape_cast %46 : vector<16x8xf32> to vector<2x8x8xf32>
    %48 = vector.extract_strided_slice %45 {offsets = [0, 8], sizes = [16, 8], strides = [1, 1]} : vector<16x32xf32> to vector<16x8xf32>
    %49 = vector.shape_cast %48 : vector<16x8xf32> to vector<2x8x8xf32>
    %50 = vector.extract_strided_slice %45 {offsets = [0, 16], sizes = [16, 8], strides = [1, 1]} : vector<16x32xf32> to vector<16x8xf32>
    %51 = vector.shape_cast %50 : vector<16x8xf32> to vector<2x8x8xf32>
    %52 = vector.extract_strided_slice %45 {offsets = [0, 24], sizes = [16, 8], strides = [1, 1]} : vector<16x32xf32> to vector<16x8xf32>
    %53 = vector.shape_cast %52 : vector<16x8xf32> to vector<2x8x8xf32>
    %54 = tpu.concatenate %47, %49, %51, %53 in 0 : vector<2x8x8xf32>, vector<2x8x8xf32>, vector<2x8x8xf32>, vector<2x8x8xf32> -> vector<8x8x8xf32>
    %55 = vector.extract_strided_slice %41 {offsets = [0, 128], sizes = [16, 32], strides = [1, 1]} : vector<16x384xf32> to vector<16x32xf32>
    %56 = vector.extract_strided_slice %8 {offsets = [5, 0], sizes = [1, 32], strides = [1, 1]} : vector<10x128xf32> to vector<1x32xf32>
    %57 = vector.broadcast %56 : vector<1x32xf32> to vector<16x32xf32>
    %58 = arith.addf %55, %57 : vector<16x32xf32>
    %59 = vector.extract_strided_slice %58 {offsets = [0, 0], sizes = [16, 8], strides = [1, 1]} : vector<16x32xf32> to vector<16x8xf32>
    %60 = vector.shape_cast %59 : vector<16x8xf32> to vector<2x8x8xf32>
    %61 = vector.extract_strided_slice %58 {offsets = [0, 8], sizes = [16, 8], strides = [1, 1]} : vector<16x32xf32> to vector<16x8xf32>
    %62 = vector.shape_cast %61 : vector<16x8xf32> to vector<2x8x8xf32>
    %63 = vector.extract_strided_slice %58 {offsets = [0, 16], sizes = [16, 8], strides = [1, 1]} : vector<16x32xf32> to vector<16x8xf32>
    %64 = vector.shape_cast %63 : vector<16x8xf32> to vector<2x8x8xf32>
    %65 = vector.extract_strided_slice %58 {offsets = [0, 24], sizes = [16, 8], strides = [1, 1]} : vector<16x32xf32> to vector<16x8xf32>
    %66 = vector.shape_cast %65 : vector<16x8xf32> to vector<2x8x8xf32>
    %67 = tpu.concatenate %60, %62, %64, %66 in 0 : vector<2x8x8xf32>, vector<2x8x8xf32>, vector<2x8x8xf32>, vector<2x8x8xf32> -> vector<8x8x8xf32>
    %68 = vector.extract_strided_slice %41 {offsets = [0, 256], sizes = [16, 32], strides = [1, 1]} : vector<16x384xf32> to vector<16x32xf32>
    %69 = vector.extract_strided_slice %8 {offsets = [6, 0], sizes = [1, 32], strides = [1, 1]} : vector<10x128xf32> to vector<1x32xf32>
    %70 = vector.broadcast %69 : vector<1x32xf32> to vector<16x32xf32>
    %71 = arith.addf %68, %70 : vector<16x32xf32>
    %72 = vector.extract_strided_slice %71 {offsets = [0, 0], sizes = [16, 8], strides = [1, 1]} : vector<16x32xf32> to vector<16x8xf32>
    %73 = vector.shape_cast %72 : vector<16x8xf32> to vector<2x8x8xf32>
    %74 = vector.extract_strided_slice %71 {offsets = [0, 8], sizes = [16, 8], strides = [1, 1]} : vector<16x32xf32> to vector<16x8xf32>
    %75 = vector.shape_cast %74 : vector<16x8xf32> to vector<2x8x8xf32>
    %76 = vector.extract_strided_slice %71 {offsets = [0, 16], sizes = [16, 8], strides = [1, 1]} : vector<16x32xf32> to vector<16x8xf32>
    %77 = vector.shape_cast %76 : vector<16x8xf32> to vector<2x8x8xf32>
    %78 = vector.extract_strided_slice %71 {offsets = [0, 24], sizes = [16, 8], strides = [1, 1]} : vector<16x32xf32> to vector<16x8xf32>
    %79 = vector.shape_cast %78 : vector<16x8xf32> to vector<2x8x8xf32>
    %80 = tpu.concatenate %73, %75, %77, %79 in 0 : vector<2x8x8xf32>, vector<2x8x8xf32>, vector<2x8x8xf32>, vector<2x8x8xf32> -> vector<8x8x8xf32>
    "tpu.trace_start"() <{level = 10 : i32, message = "gqe,gke->gqk"}> : () -> ()
    %cst_24 = arith.constant dense<0.000000e+00> : vector<8x8x8xf32>
    %81 = tpu.matmul %54, %67, %cst_24 {dimension_numbers = #tpu.dot_dimension_numbers<[2], [2], [1], [1], [0, 0, 0, 1, 1, 1], [0], [0]>} : vector<8x8x8xf32>, vector<8x8x8xf32>, vector<8x8x8xf32> -> vector<8x8x8xf32>
    "tpu.trace_stop"() : () -> ()
    %82 = vector.broadcast %6 : vector<1x8x8xf32> to vector<8x8x8xf32>
    %83 = arith.addf %81, %82 : vector<8x8x8xf32>
    %cst_25 = arith.constant dense<0xFF800000> : vector<8x8xf32>
    %84 = vector.multi_reduction <maximumf>, %83, %cst_25 [2] : vector<8x8x8xf32> to vector<8x8xf32>
    %85 = vector.shape_cast %84 : vector<8x8xf32> to vector<8x8x1xf32>
    %86 = vector.broadcast %85 : vector<8x8x1xf32> to vector<8x8x8xf32>
    %87 = arith.subf %83, %86 : vector<8x8x8xf32>
    %88 = math.exp %87 : vector<8x8x8xf32>
    %cst_26 = arith.constant dense<0.000000e+00> : vector<8x8xf32>
    %89 = vector.multi_reduction <add>, %88, %cst_26 [2] : vector<8x8x8xf32> to vector<8x8xf32>
    %90 = vector.shape_cast %89 : vector<8x8xf32> to vector<8x8x1xf32>
    %cst_27 = arith.constant 1.000000e+00 : f32
    %91 = vector.broadcast %cst_27 : f32 to vector<8x8x1xf32>
    %92 = arith.divf %91, %90 : vector<8x8x1xf32>
    %93 = vector.broadcast %92 : vector<8x8x1xf32> to vector<8x8x8xf32>
    %94 = arith.mulf %88, %93 : vector<8x8x8xf32>
    "tpu.trace_start"() <{level = 10 : i32, message = "gqk,gke->gqe"}> : () -> ()
    %cst_28 = arith.constant dense<0.000000e+00> : vector<8x8x8xf32>
    %95 = tpu.matmul %94, %80, %cst_28 {dimension_numbers = #tpu.dot_dimension_numbers<[2], [1], [1], [2], [0, 0, 0, 1, 1, 2], [0], [0]>} : vector<8x8x8xf32>, vector<8x8x8xf32>, vector<8x8x8xf32> -> vector<8x8x8xf32>
    "tpu.trace_stop"() : () -> ()
    %96 = vector.extract_strided_slice %95 {offsets = [0, 0, 0], sizes = [2, 8, 8], strides = [1, 1, 1]} : vector<8x8x8xf32> to vector<2x8x8xf32>
    %97 = vector.shape_cast %96 : vector<2x8x8xf32> to vector<16x8xf32>
    %98 = vector.extract_strided_slice %12 {offsets = [0, 0, 0], sizes = [1, 8, 128], strides = [1, 1, 1]} : vector<4x8x128xf32> to vector<1x8x128xf32>
    %99 = vector.shape_cast %98 : vector<1x8x128xf32> to vector<8x128xf32>
    %cst_29 = arith.constant dense<0.000000e+00> : vector<16x128xf32>
    %100 = tpu.matmul %97, %99, %cst_29 {dimension_numbers = #tpu.dot_dimension_numbers<[1], [0], [0], [1], [0, 0, 1, 1], [], []>} : vector<16x8xf32>, vector<8x128xf32>, vector<16x128xf32> -> vector<16x128xf32>
    %101 = vector.extract_strided_slice %95 {offsets = [2, 0, 0], sizes = [2, 8, 8], strides = [1, 1, 1]} : vector<8x8x8xf32> to vector<2x8x8xf32>
    %102 = vector.shape_cast %101 : vector<2x8x8xf32> to vector<16x8xf32>
    %103 = vector.extract_strided_slice %12 {offsets = [1, 0, 0], sizes = [1, 8, 128], strides = [1, 1, 1]} : vector<4x8x128xf32> to vector<1x8x128xf32>
    %104 = vector.shape_cast %103 : vector<1x8x128xf32> to vector<8x128xf32>
    %cst_30 = arith.constant dense<0.000000e+00> : vector<16x128xf32>
    %105 = tpu.matmul %102, %104, %cst_30 {dimension_numbers = #tpu.dot_dimension_numbers<[1], [0], [0], [1], [0, 0, 1, 1], [], []>} : vector<16x8xf32>, vector<8x128xf32>, vector<16x128xf32> -> vector<16x128xf32>
    %106 = arith.addf %100, %105 : vector<16x128xf32>
    %107 = vector.extract_strided_slice %95 {offsets = [4, 0, 0], sizes = [2, 8, 8], strides = [1, 1, 1]} : vector<8x8x8xf32> to vector<2x8x8xf32>
    %108 = vector.shape_cast %107 : vector<2x8x8xf32> to vector<16x8xf32>
    %109 = vector.extract_strided_slice %12 {offsets = [2, 0, 0], sizes = [1, 8, 128], strides = [1, 1, 1]} : vector<4x8x128xf32> to vector<1x8x128xf32>
    %110 = vector.shape_cast %109 : vector<1x8x128xf32> to vector<8x128xf32>
    %cst_31 = arith.constant dense<0.000000e+00> : vector<16x128xf32>
    %111 = tpu.matmul %108, %110, %cst_31 {dimension_numbers = #tpu.dot_dimension_numbers<[1], [0], [0], [1], [0, 0, 1, 1], [], []>} : vector<16x8xf32>, vector<8x128xf32>, vector<16x128xf32> -> vector<16x128xf32>
    %112 = arith.addf %106, %111 : vector<16x128xf32>
    %113 = vector.extract_strided_slice %95 {offsets = [6, 0, 0], sizes = [2, 8, 8], strides = [1, 1, 1]} : vector<8x8x8xf32> to vector<2x8x8xf32>
    %114 = vector.shape_cast %113 : vector<2x8x8xf32> to vector<16x8xf32>
    %115 = vector.extract_strided_slice %12 {offsets = [3, 0, 0], sizes = [1, 8, 128], strides = [1, 1, 1]} : vector<4x8x128xf32> to vector<1x8x128xf32>
    %116 = vector.shape_cast %115 : vector<1x8x128xf32> to vector<8x128xf32>
    %cst_32 = arith.constant dense<0.000000e+00> : vector<16x128xf32>
    %117 = tpu.matmul %114, %116, %cst_32 {dimension_numbers = #tpu.dot_dimension_numbers<[1], [0], [0], [1], [0, 0, 1, 1], [], []>} : vector<16x8xf32>, vector<8x128xf32>, vector<16x128xf32> -> vector<16x128xf32>
    %118 = arith.addf %112, %117 : vector<16x128xf32>
    %119 = arith.addf %0, %118 : vector<16x128xf32>
    %120 = vector.extract_strided_slice %8 {offsets = [7, 0], sizes = [1, 128], strides = [1, 1]} : vector<10x128xf32> to vector<1x128xf32>
    %121 = vector.broadcast %120 : vector<1x128xf32> to vector<16x128xf32>
    %122 = arith.addf %119, %121 : vector<16x128xf32>
    %123 = vector.extract_strided_slice %8 {offsets = [2, 0], sizes = [1, 128], strides = [1, 1]} : vector<10x128xf32> to vector<1x128xf32>
    %124 = vector.extract_strided_slice %8 {offsets = [3, 0], sizes = [1, 128], strides = [1, 1]} : vector<10x128xf32> to vector<1x128xf32>
    %cst_33 = arith.constant dense<0.000000e+00> : vector<16xf32>
    %125 = vector.multi_reduction <add>, %122, %cst_33 [1] : vector<16x128xf32> to vector<16xf32>
    %126 = vector.shape_cast %125 : vector<16xf32> to vector<16x1xf32>
    %cst_34 = arith.constant 3.125000e-02 : f32
    %127 = vector.broadcast %cst_34 : f32 to vector<16x1xf32>
    %128 = arith.mulf %126, %127 : vector<16x1xf32>
    %129 = arith.mulf %122, %122 : vector<16x128xf32>
    %cst_35 = arith.constant dense<0.000000e+00> : vector<16xf32>
    %130 = vector.multi_reduction <add>, %129, %cst_35 [1] : vector<16x128xf32> to vector<16xf32>
    %131 = vector.shape_cast %130 : vector<16xf32> to vector<16x1xf32>
    %cst_36 = arith.constant 3.125000e-02 : f32
    %132 = vector.broadcast %cst_36 : f32 to vector<16x1xf32>
    %133 = arith.mulf %131, %132 : vector<16x1xf32>
    %134 = arith.mulf %128, %128 : vector<16x1xf32>
    %135 = arith.subf %133, %134 : vector<16x1xf32>
    %136 = vector.broadcast %128 : vector<16x1xf32> to vector<16x128xf32>
    %137 = arith.subf %122, %136 : vector<16x128xf32>
    %cst_37 = arith.constant 9.99999974E-6 : f32
    %138 = vector.broadcast %cst_37 : f32 to vector<16x1xf32>
    %139 = arith.addf %135, %138 : vector<16x1xf32>
    %140 = math.rsqrt %139 : vector<16x1xf32>
    %141 = vector.broadcast %140 : vector<16x1xf32> to vector<16x128xf32>
    %142 = arith.mulf %137, %141 : vector<16x128xf32>
    %143 = vector.broadcast %123 : vector<1x128xf32> to vector<16x128xf32>
    %144 = arith.mulf %142, %143 : vector<16x128xf32>
    %145 = vector.broadcast %124 : vector<1x128xf32> to vector<16x128xf32>
    %146 = arith.addf %144, %145 : vector<16x128xf32>
    %cst_38 = arith.constant dense<0.000000e+00> : vector<16x128xf32>
    %147 = tpu.matmul %146, %14, %cst_38 {dimension_numbers = #tpu.dot_dimension_numbers<[1], [0], [0], [1], [0, 0, 1, 1], [], []>} : vector<16x128xf32>, vector<128x128xf32>, vector<16x128xf32> -> vector<16x128xf32>
    %148 = vector.extract_strided_slice %8 {offsets = [8, 0], sizes = [1, 128], strides = [1, 1]} : vector<10x128xf32> to vector<1x128xf32>
    %149 = vector.broadcast %148 : vector<1x128xf32> to vector<16x128xf32>
    %150 = arith.addf %147, %149 : vector<16x128xf32>
    %151 = arith.mulf %150, %150 : vector<16x128xf32>
    %152 = arith.mulf %150, %151 : vector<16x128xf32>
    %cst_39 = arith.constant 4.471500e-02 : f32
    %153 = vector.broadcast %cst_39 : f32 to vector<16x128xf32>
    %154 = arith.mulf %153, %152 : vector<16x128xf32>
    %155 = arith.addf %150, %154 : vector<16x128xf32>
    %cst_40 = arith.constant 0.797884583 : f32
    %156 = vector.broadcast %cst_40 : f32 to vector<16x128xf32>
    %157 = arith.mulf %156, %155 : vector<16x128xf32>
    %158 = math.tanh %157 : vector<16x128xf32>
    %cst_41 = arith.constant 1.000000e+00 : f32
    %159 = vector.broadcast %cst_41 : f32 to vector<16x128xf32>
    %160 = arith.addf %159, %158 : vector<16x128xf32>
    %cst_42 = arith.constant 5.000000e-01 : f32
    %161 = vector.broadcast %cst_42 : f32 to vector<16x128xf32>
    %162 = arith.mulf %161, %160 : vector<16x128xf32>
    %163 = arith.mulf %150, %162 : vector<16x128xf32>
    %cst_43 = arith.constant dense<0.000000e+00> : vector<16x128xf32>
    %164 = tpu.matmul %163, %16, %cst_43 {dimension_numbers = #tpu.dot_dimension_numbers<[1], [0], [0], [1], [0, 0, 1, 1], [], []>} : vector<16x128xf32>, vector<128x128xf32>, vector<16x128xf32> -> vector<16x128xf32>
    %165 = arith.addf %122, %164 : vector<16x128xf32>
    %166 = vector.extract_strided_slice %8 {offsets = [9, 0], sizes = [1, 128], strides = [1, 1]} : vector<10x128xf32> to vector<1x128xf32>
    %167 = vector.broadcast %166 : vector<1x128xf32> to vector<16x128xf32>
    %168 = arith.addf %165, %167 : vector<16x128xf32>
    %c1 = arith.constant 1 : index
    %c0_44 = arith.constant 0 : index
    %c0_45 = arith.constant 0 : index
    %169 = vector.load %arg1[%c1, %c0_44, %c0_45] : memref<2x10x128xf32, #tpu.memory_space<vmem>>, vector<1x10x128xf32>
    %170 = vector.shape_cast %169 : vector<1x10x128xf32> to vector<10x128xf32>
    %c1_46 = arith.constant 1 : index
    %c0_47 = arith.constant 0 : index
    %c0_48 = arith.constant 0 : index
    %171 = vector.load %arg2[%c1_46, %c0_47, %c0_48] : memref<2x128x384xf32, #tpu.memory_space<vmem>>, vector<1x128x384xf32>
    %172 = vector.shape_cast %171 : vector<1x128x384xf32> to vector<128x384xf32>
    %c1_49 = arith.constant 1 : index
    %c0_50 = arith.constant 0 : index
    %c0_51 = arith.constant 0 : index
    %c0_52 = arith.constant 0 : index
    %173 = vector.load %arg3[%c1_49, %c0_50, %c0_51, %c0_52] : memref<2x4x8x128xf32, #tpu.memory_space<vmem>>, vector<1x4x8x128xf32>
    %174 = vector.shape_cast %173 : vector<1x4x8x128xf32> to vector<4x8x128xf32>
    %c1_53 = arith.constant 1 : index
    %c0_54 = arith.constant 0 : index
    %c0_55 = arith.constant 0 : index
    %175 = vector.load %arg4[%c1_53, %c0_54, %c0_55] : memref<2x128x128xf32, #tpu.memory_space<vmem>>, vector<1x128x128xf32>
    %176 = vector.shape_cast %175 : vector<1x128x128xf32> to vector<128x128xf32>
    %c1_56 = arith.constant 1 : index
    %c0_57 = arith.constant 0 : index
    %c0_58 = arith.constant 0 : index
    %177 = vector.load %arg5[%c1_56, %c0_57, %c0_58] : memref<2x128x128xf32, #tpu.memory_space<vmem>>, vector<1x128x128xf32>
    %178 = vector.shape_cast %177 : vector<1x128x128xf32> to vector<128x128xf32>
    %179 = vector.extract_strided_slice %170 {offsets = [0, 0], sizes = [1, 128], strides = [1, 1]} : vector<10x128xf32> to vector<1x128xf32>
    %180 = vector.extract_strided_slice %170 {offsets = [1, 0], sizes = [1, 128], strides = [1, 1]} : vector<10x128xf32> to vector<1x128xf32>
    %cst_59 = arith.constant dense<0.000000e+00> : vector<16xf32>
    %181 = vector.multi_reduction <add>, %168, %cst_59 [1] : vector<16x128xf32> to vector<16xf32>
    %182 = vector.shape_cast %181 : vector<16xf32> to vector<16x1xf32>
    %cst_60 = arith.constant 3.125000e-02 : f32
    %183 = vector.broadcast %cst_60 : f32 to vector<16x1xf32>
    %184 = arith.mulf %182, %183 : vector<16x1xf32>
    %185 = arith.mulf %168, %168 : vector<16x128xf32>
    %cst_61 = arith.constant dense<0.000000e+00> : vector<16xf32>
    %186 = vector.multi_reduction <add>, %185, %cst_61 [1] : vector<16x128xf32> to vector<16xf32>
    %187 = vector.shape_cast %186 : vector<16xf32> to vector<16x1xf32>
    %cst_62 = arith.constant 3.125000e-02 : f32
    %188 = vector.broadcast %cst_62 : f32 to vector<16x1xf32>
    %189 = arith.mulf %187, %188 : vector<16x1xf32>
    %190 = arith.mulf %184, %184 : vector<16x1xf32>
    %191 = arith.subf %189, %190 : vector<16x1xf32>
    %192 = vector.broadcast %184 : vector<16x1xf32> to vector<16x128xf32>
    %193 = arith.subf %168, %192 : vector<16x128xf32>
    %cst_63 = arith.constant 9.99999974E-6 : f32
    %194 = vector.broadcast %cst_63 : f32 to vector<16x1xf32>
    %195 = arith.addf %191, %194 : vector<16x1xf32>
    %196 = math.rsqrt %195 : vector<16x1xf32>
    %197 = vector.broadcast %196 : vector<16x1xf32> to vector<16x128xf32>
    %198 = arith.mulf %193, %197 : vector<16x128xf32>
    %199 = vector.broadcast %179 : vector<1x128xf32> to vector<16x128xf32>
    %200 = arith.mulf %198, %199 : vector<16x128xf32>
    %201 = vector.broadcast %180 : vector<1x128xf32> to vector<16x128xf32>
    %202 = arith.addf %200, %201 : vector<16x128xf32>
    %cst_64 = arith.constant dense<0.000000e+00> : vector<16x384xf32>
    %203 = tpu.matmul %202, %172, %cst_64 {dimension_numbers = #tpu.dot_dimension_numbers<[1], [0], [0], [1], [0, 0, 1, 1], [], []>} : vector<16x128xf32>, vector<128x384xf32>, vector<16x384xf32> -> vector<16x384xf32>
    %204 = vector.extract_strided_slice %203 {offsets = [0, 0], sizes = [16, 32], strides = [1, 1]} : vector<16x384xf32> to vector<16x32xf32>
    %205 = vector.extract_strided_slice %170 {offsets = [4, 0], sizes = [1, 32], strides = [1, 1]} : vector<10x128xf32> to vector<1x32xf32>
    %206 = vector.broadcast %205 : vector<1x32xf32> to vector<16x32xf32>
    %207 = arith.addf %204, %206 : vector<16x32xf32>
    %208 = vector.extract_strided_slice %207 {offsets = [0, 0], sizes = [16, 8], strides = [1, 1]} : vector<16x32xf32> to vector<16x8xf32>
    %209 = vector.shape_cast %208 : vector<16x8xf32> to vector<2x8x8xf32>
    %210 = vector.extract_strided_slice %207 {offsets = [0, 8], sizes = [16, 8], strides = [1, 1]} : vector<16x32xf32> to vector<16x8xf32>
    %211 = vector.shape_cast %210 : vector<16x8xf32> to vector<2x8x8xf32>
    %212 = vector.extract_strided_slice %207 {offsets = [0, 16], sizes = [16, 8], strides = [1, 1]} : vector<16x32xf32> to vector<16x8xf32>
    %213 = vector.shape_cast %212 : vector<16x8xf32> to vector<2x8x8xf32>
    %214 = vector.extract_strided_slice %207 {offsets = [0, 24], sizes = [16, 8], strides = [1, 1]} : vector<16x32xf32> to vector<16x8xf32>
    %215 = vector.shape_cast %214 : vector<16x8xf32> to vector<2x8x8xf32>
    %216 = tpu.concatenate %209, %211, %213, %215 in 0 : vector<2x8x8xf32>, vector<2x8x8xf32>, vector<2x8x8xf32>, vector<2x8x8xf32> -> vector<8x8x8xf32>
    %217 = vector.extract_strided_slice %203 {offsets = [0, 128], sizes = [16, 32], strides = [1, 1]} : vector<16x384xf32> to vector<16x32xf32>
    %218 = vector.extract_strided_slice %170 {offsets = [5, 0], sizes = [1, 32], strides = [1, 1]} : vector<10x128xf32> to vector<1x32xf32>
    %219 = vector.broadcast %218 : vector<1x32xf32> to vector<16x32xf32>
    %220 = arith.addf %217, %219 : vector<16x32xf32>
    %221 = vector.extract_strided_slice %220 {offsets = [0, 0], sizes = [16, 8], strides = [1, 1]} : vector<16x32xf32> to vector<16x8xf32>
    %222 = vector.shape_cast %221 : vector<16x8xf32> to vector<2x8x8xf32>
    %223 = vector.extract_strided_slice %220 {offsets = [0, 8], sizes = [16, 8], strides = [1, 1]} : vector<16x32xf32> to vector<16x8xf32>
    %224 = vector.shape_cast %223 : vector<16x8xf32> to vector<2x8x8xf32>
    %225 = vector.extract_strided_slice %220 {offsets = [0, 16], sizes = [16, 8], strides = [1, 1]} : vector<16x32xf32> to vector<16x8xf32>
    %226 = vector.shape_cast %225 : vector<16x8xf32> to vector<2x8x8xf32>
    %227 = vector.extract_strided_slice %220 {offsets = [0, 24], sizes = [16, 8], strides = [1, 1]} : vector<16x32xf32> to vector<16x8xf32>
    %228 = vector.shape_cast %227 : vector<16x8xf32> to vector<2x8x8xf32>
    %229 = tpu.concatenate %222, %224, %226, %228 in 0 : vector<2x8x8xf32>, vector<2x8x8xf32>, vector<2x8x8xf32>, vector<2x8x8xf32> -> vector<8x8x8xf32>
    %230 = vector.extract_strided_slice %203 {offsets = [0, 256], sizes = [16, 32], strides = [1, 1]} : vector<16x384xf32> to vector<16x32xf32>
    %231 = vector.extract_strided_slice %170 {offsets = [6, 0], sizes = [1, 32], strides = [1, 1]} : vector<10x128xf32> to vector<1x32xf32>
    %232 = vector.broadcast %231 : vector<1x32xf32> to vector<16x32xf32>
    %233 = arith.addf %230, %232 : vector<16x32xf32>
    %234 = vector.extract_strided_slice %233 {offsets = [0, 0], sizes = [16, 8], strides = [1, 1]} : vector<16x32xf32> to vector<16x8xf32>
    %235 = vector.shape_cast %234 : vector<16x8xf32> to vector<2x8x8xf32>
    %236 = vector.extract_strided_slice %233 {offsets = [0, 8], sizes = [16, 8], strides = [1, 1]} : vector<16x32xf32> to vector<16x8xf32>
    %237 = vector.shape_cast %236 : vector<16x8xf32> to vector<2x8x8xf32>
    %238 = vector.extract_strided_slice %233 {offsets = [0, 16], sizes = [16, 8], strides = [1, 1]} : vector<16x32xf32> to vector<16x8xf32>
    %239 = vector.shape_cast %238 : vector<16x8xf32> to vector<2x8x8xf32>
    %240 = vector.extract_strided_slice %233 {offsets = [0, 24], sizes = [16, 8], strides = [1, 1]} : vector<16x32xf32> to vector<16x8xf32>
    %241 = vector.shape_cast %240 : vector<16x8xf32> to vector<2x8x8xf32>
    %242 = tpu.concatenate %235, %237, %239, %241 in 0 : vector<2x8x8xf32>, vector<2x8x8xf32>, vector<2x8x8xf32>, vector<2x8x8xf32> -> vector<8x8x8xf32>
    "tpu.trace_start"() <{level = 10 : i32, message = "gqe,gke->gqk"}> : () -> ()
    %cst_65 = arith.constant dense<0.000000e+00> : vector<8x8x8xf32>
    %243 = tpu.matmul %216, %229, %cst_65 {dimension_numbers = #tpu.dot_dimension_numbers<[2], [2], [1], [1], [0, 0, 0, 1, 1, 1], [0], [0]>} : vector<8x8x8xf32>, vector<8x8x8xf32>, vector<8x8x8xf32> -> vector<8x8x8xf32>
    "tpu.trace_stop"() : () -> ()
    %244 = vector.broadcast %6 : vector<1x8x8xf32> to vector<8x8x8xf32>
    %245 = arith.addf %243, %244 : vector<8x8x8xf32>
    %cst_66 = arith.constant dense<0xFF800000> : vector<8x8xf32>
    %246 = vector.multi_reduction <maximumf>, %245, %cst_66 [2] : vector<8x8x8xf32> to vector<8x8xf32>
    %247 = vector.shape_cast %246 : vector<8x8xf32> to vector<8x8x1xf32>
    %248 = vector.broadcast %247 : vector<8x8x1xf32> to vector<8x8x8xf32>
    %249 = arith.subf %245, %248 : vector<8x8x8xf32>
    %250 = math.exp %249 : vector<8x8x8xf32>
    %cst_67 = arith.constant dense<0.000000e+00> : vector<8x8xf32>
    %251 = vector.multi_reduction <add>, %250, %cst_67 [2] : vector<8x8x8xf32> to vector<8x8xf32>
    %252 = vector.shape_cast %251 : vector<8x8xf32> to vector<8x8x1xf32>
    %cst_68 = arith.constant 1.000000e+00 : f32
    %253 = vector.broadcast %cst_68 : f32 to vector<8x8x1xf32>
    %254 = arith.divf %253, %252 : vector<8x8x1xf32>
    %255 = vector.broadcast %254 : vector<8x8x1xf32> to vector<8x8x8xf32>
    %256 = arith.mulf %250, %255 : vector<8x8x8xf32>
    "tpu.trace_start"() <{level = 10 : i32, message = "gqk,gke->gqe"}> : () -> ()
    %cst_69 = arith.constant dense<0.000000e+00> : vector<8x8x8xf32>
    %257 = tpu.matmul %256, %242, %cst_69 {dimension_numbers = #tpu.dot_dimension_numbers<[2], [1], [1], [2], [0, 0, 0, 1, 1, 2], [0], [0]>} : vector<8x8x8xf32>, vector<8x8x8xf32>, vector<8x8x8xf32> -> vector<8x8x8xf32>
    "tpu.trace_stop"() : () -> ()
    %258 = vector.extract_strided_slice %257 {offsets = [0, 0, 0], sizes = [2, 8, 8], strides = [1, 1, 1]} : vector<8x8x8xf32> to vector<2x8x8xf32>
    %259 = vector.shape_cast %258 : vector<2x8x8xf32> to vector<16x8xf32>
    %260 = vector.extract_strided_slice %174 {offsets = [0, 0, 0], sizes = [1, 8, 128], strides = [1, 1, 1]} : vector<4x8x128xf32> to vector<1x8x128xf32>
    %261 = vector.shape_cast %260 : vector<1x8x128xf32> to vector<8x128xf32>
    %cst_70 = arith.constant dense<0.000000e+00> : vector<16x128xf32>
    %262 = tpu.matmul %259, %261, %cst_70 {dimension_numbers = #tpu.dot_dimension_numbers<[1], [0], [0], [1], [0, 0, 1, 1], [], []>} : vector<16x8xf32>, vector<8x128xf32>, vector<16x128xf32> -> vector<16x128xf32>
    %263 = vector.extract_strided_slice %257 {offsets = [2, 0, 0], sizes = [2, 8, 8], strides = [1, 1, 1]} : vector<8x8x8xf32> to vector<2x8x8xf32>
    %264 = vector.shape_cast %263 : vector<2x8x8xf32> to vector<16x8xf32>
    %265 = vector.extract_strided_slice %174 {offsets = [1, 0, 0], sizes = [1, 8, 128], strides = [1, 1, 1]} : vector<4x8x128xf32> to vector<1x8x128xf32>
    %266 = vector.shape_cast %265 : vector<1x8x128xf32> to vector<8x128xf32>
    %cst_71 = arith.constant dense<0.000000e+00> : vector<16x128xf32>
    %267 = tpu.matmul %264, %266, %cst_71 {dimension_numbers = #tpu.dot_dimension_numbers<[1], [0], [0], [1], [0, 0, 1, 1], [], []>} : vector<16x8xf32>, vector<8x128xf32>, vector<16x128xf32> -> vector<16x128xf32>
    %268 = arith.addf %262, %267 : vector<16x128xf32>
    %269 = vector.extract_strided_slice %257 {offsets = [4, 0, 0], sizes = [2, 8, 8], strides = [1, 1, 1]} : vector<8x8x8xf32> to vector<2x8x8xf32>
    %270 = vector.shape_cast %269 : vector<2x8x8xf32> to vector<16x8xf32>
    %271 = vector.extract_strided_slice %174 {offsets = [2, 0, 0], sizes = [1, 8, 128], strides = [1, 1, 1]} : vector<4x8x128xf32> to vector<1x8x128xf32>
    %272 = vector.shape_cast %271 : vector<1x8x128xf32> to vector<8x128xf32>
    %cst_72 = arith.constant dense<0.000000e+00> : vector<16x128xf32>
    %273 = tpu.matmul %270, %272, %cst_72 {dimension_numbers = #tpu.dot_dimension_numbers<[1], [0], [0], [1], [0, 0, 1, 1], [], []>} : vector<16x8xf32>, vector<8x128xf32>, vector<16x128xf32> -> vector<16x128xf32>
    %274 = arith.addf %268, %273 : vector<16x128xf32>
    %275 = vector.extract_strided_slice %257 {offsets = [6, 0, 0], sizes = [2, 8, 8], strides = [1, 1, 1]} : vector<8x8x8xf32> to vector<2x8x8xf32>
    %276 = vector.shape_cast %275 : vector<2x8x8xf32> to vector<16x8xf32>
    %277 = vector.extract_strided_slice %174 {offsets = [3, 0, 0], sizes = [1, 8, 128], strides = [1, 1, 1]} : vector<4x8x128xf32> to vector<1x8x128xf32>
    %278 = vector.shape_cast %277 : vector<1x8x128xf32> to vector<8x128xf32>
    %cst_73 = arith.constant dense<0.000000e+00> : vector<16x128xf32>
    %279 = tpu.matmul %276, %278, %cst_73 {dimension_numbers = #tpu.dot_dimension_numbers<[1], [0], [0], [1], [0, 0, 1, 1], [], []>} : vector<16x8xf32>, vector<8x128xf32>, vector<16x128xf32> -> vector<16x128xf32>
    %280 = arith.addf %274, %279 : vector<16x128xf32>
    %281 = arith.addf %168, %280 : vector<16x128xf32>
    %282 = vector.extract_strided_slice %170 {offsets = [7, 0], sizes = [1, 128], strides = [1, 1]} : vector<10x128xf32> to vector<1x128xf32>
    %283 = vector.broadcast %282 : vector<1x128xf32> to vector<16x128xf32>
    %284 = arith.addf %281, %283 : vector<16x128xf32>
    %285 = vector.extract_strided_slice %170 {offsets = [2, 0], sizes = [1, 128], strides = [1, 1]} : vector<10x128xf32> to vector<1x128xf32>
    %286 = vector.extract_strided_slice %170 {offsets = [3, 0], sizes = [1, 128], strides = [1, 1]} : vector<10x128xf32> to vector<1x128xf32>
    %cst_74 = arith.constant dense<0.000000e+00> : vector<16xf32>
    %287 = vector.multi_reduction <add>, %284, %cst_74 [1] : vector<16x128xf32> to vector<16xf32>
    %288 = vector.shape_cast %287 : vector<16xf32> to vector<16x1xf32>
    %cst_75 = arith.constant 3.125000e-02 : f32
    %289 = vector.broadcast %cst_75 : f32 to vector<16x1xf32>
    %290 = arith.mulf %288, %289 : vector<16x1xf32>
    %291 = arith.mulf %284, %284 : vector<16x128xf32>
    %cst_76 = arith.constant dense<0.000000e+00> : vector<16xf32>
    %292 = vector.multi_reduction <add>, %291, %cst_76 [1] : vector<16x128xf32> to vector<16xf32>
    %293 = vector.shape_cast %292 : vector<16xf32> to vector<16x1xf32>
    %cst_77 = arith.constant 3.125000e-02 : f32
    %294 = vector.broadcast %cst_77 : f32 to vector<16x1xf32>
    %295 = arith.mulf %293, %294 : vector<16x1xf32>
    %296 = arith.mulf %290, %290 : vector<16x1xf32>
    %297 = arith.subf %295, %296 : vector<16x1xf32>
    %298 = vector.broadcast %290 : vector<16x1xf32> to vector<16x128xf32>
    %299 = arith.subf %284, %298 : vector<16x128xf32>
    %cst_78 = arith.constant 9.99999974E-6 : f32
    %300 = vector.broadcast %cst_78 : f32 to vector<16x1xf32>
    %301 = arith.addf %297, %300 : vector<16x1xf32>
    %302 = math.rsqrt %301 : vector<16x1xf32>
    %303 = vector.broadcast %302 : vector<16x1xf32> to vector<16x128xf32>
    %304 = arith.mulf %299, %303 : vector<16x128xf32>
    %305 = vector.broadcast %285 : vector<1x128xf32> to vector<16x128xf32>
    %306 = arith.mulf %304, %305 : vector<16x128xf32>
    %307 = vector.broadcast %286 : vector<1x128xf32> to vector<16x128xf32>
    %308 = arith.addf %306, %307 : vector<16x128xf32>
    %cst_79 = arith.constant dense<0.000000e+00> : vector<16x128xf32>
    %309 = tpu.matmul %308, %176, %cst_79 {dimension_numbers = #tpu.dot_dimension_numbers<[1], [0], [0], [1], [0, 0, 1, 1], [], []>} : vector<16x128xf32>, vector<128x128xf32>, vector<16x128xf32> -> vector<16x128xf32>
    %310 = vector.extract_strided_slice %170 {offsets = [8, 0], sizes = [1, 128], strides = [1, 1]} : vector<10x128xf32> to vector<1x128xf32>
    %311 = vector.broadcast %310 : vector<1x128xf32> to vector<16x128xf32>
    %312 = arith.addf %309, %311 : vector<16x128xf32>
    %313 = arith.mulf %312, %312 : vector<16x128xf32>
    %314 = arith.mulf %312, %313 : vector<16x128xf32>
    %cst_80 = arith.constant 4.471500e-02 : f32
    %315 = vector.broadcast %cst_80 : f32 to vector<16x128xf32>
    %316 = arith.mulf %315, %314 : vector<16x128xf32>
    %317 = arith.addf %312, %316 : vector<16x128xf32>
    %cst_81 = arith.constant 0.797884583 : f32
    %318 = vector.broadcast %cst_81 : f32 to vector<16x128xf32>
    %319 = arith.mulf %318, %317 : vector<16x128xf32>
    %320 = math.tanh %319 : vector<16x128xf32>
    %cst_82 = arith.constant 1.000000e+00 : f32
    %321 = vector.broadcast %cst_82 : f32 to vector<16x128xf32>
    %322 = arith.addf %321, %320 : vector<16x128xf32>
    %cst_83 = arith.constant 5.000000e-01 : f32
    %323 = vector.broadcast %cst_83 : f32 to vector<16x128xf32>
    %324 = arith.mulf %323, %322 : vector<16x128xf32>
    %325 = arith.mulf %312, %324 : vector<16x128xf32>
    %cst_84 = arith.constant dense<0.000000e+00> : vector<16x128xf32>
    %326 = tpu.matmul %325, %178, %cst_84 {dimension_numbers = #tpu.dot_dimension_numbers<[1], [0], [0], [1], [0, 0, 1, 1], [], []>} : vector<16x128xf32>, vector<128x128xf32>, vector<16x128xf32> -> vector<16x128xf32>
    %327 = arith.addf %284, %326 : vector<16x128xf32>
    %328 = vector.extract_strided_slice %170 {offsets = [9, 0], sizes = [1, 128], strides = [1, 1]} : vector<10x128xf32> to vector<1x128xf32>
    %329 = vector.broadcast %328 : vector<1x128xf32> to vector<16x128xf32>
    %330 = arith.addf %327, %329 : vector<16x128xf32>
    %c0_85 = arith.constant 0 : index
    %c0_86 = arith.constant 0 : index
    %331 = vector.load %arg6[%c0_85, %c0_86] : memref<16x128xf32, #tpu.memory_space<vmem>>, vector<16x128xf32>
    tpu.vector_store %arg6[%c0_85, %c0_86], %330 {strides = array<i32>} : memref<16x128xf32, #tpu.memory_space<vmem>>, vector<16x128xf32>,
    return
  }
}

</mosaic_0001>

<bundles_post_ra>
// kernel: tpu_custom_call.1
= control target key start
LH: loop header
LB: loop body
LE: loop exit
PB: predicated region body
PF: predicated region fallthrough
CT: control target
= control target key end

     0   :  { %11 = vsyncpa [#allocation3], 0  ;;  %s6168_s0 = inlined_call_operand.vmem [shape: f32[16,128], index: 0, kind: input, shape index: {}]   ;;  %s6169_s1 = inlined_call_operand.vmem [shape: f32[2,10,128], index: 1, kind: input, shape index: {}]   ;;  %s6170_s2 = inlined_call_operand.hbm [shape: f32[2,128,384], index: 2, kind: input, shape index: {}]   ;;  %s6171_s3 = inlined_call_operand.hbm [shape: f32[2,4,8,128], index: 3, kind: input, shape index: {}]   ;;  %s6172_s4 = inlined_call_operand.hbm [shape: f32[2,128,128], index: 4, kind: input, shape index: {}]   ;;  %s6173_s5 = inlined_call_operand.hbm [shape: f32[2,128,128], index: 5, kind: input, shape index: {}]   ;;  %s6174_s6 = inlined_call_operand.hbm [shape: f32[16,128], index: 6, kind: output, shape index: {}]  }
   0x1   :  { %12 = vsyncpa [#allocation6], 0 }
   0x2   :  { %13 = vsyncpa [#allocation9], 0 }
   0x3   :  { %14 = vsyncpa [#allocation4], 0  ;;  %s5611_s21 = smov [#allocation5]   ;;  %s5493_s25 = scalar_lea.hbm %s6171_s3, 1024 }
   0x4   :  { %s36_s22 = sshll.u32 %s5611_s21, 4  ;;  %p5494_p0 = scmp.ne.s32.totalorder %s6171_s3, %s5493_s25  ;;  %s37_s22 = int_to_ptr.vmem [resolvable:$true] %s36_s22 }
   0x5   :  { %p5497_p1 = scmp.lt.u32.totalorder %s5493_s25, %s6171_s3 }
   0x7   :  { %p5499_p2 = pnand %p5497_p1, %p5494_p0 }
   0x9   :  { %5502 = shalt.err (!%p5499_p2)
}
   0xa   :  { %s5503_s30 = scalar_lea.vmem %s37_s22, 1024  ;;  %p5508_p4 = scmp.lt.s32.totalorder %s37_s22, %s37_s22 }
   0xb   :  { %p5504_p3 = scmp.ne.s32.totalorder %s37_s22, %s5503_s30  ;;  %p5509_p5 = scmp.lt.s32.totalorder %s5503_s30, %s5503_s30 }
   0xd   :  { %p5510_p6 = por %p5509_p5, %p5508_p4 }
   0xf   :  { %p5511_p7 = pnand %p5510_p6, %p5504_p3 }
  0x11   :  { %5514 = shalt.err (!%p5511_p7)
}
  0x12   :  { %s5612_s7 = smov 128   ;;  %s5613_s8 = smov 8  }
  0x13   :  { %42 = dma.hbm_to_vmem [thread:$0]  %s6171_s3, 1024, %s37_s22, [#allocation6], %s5612_s7, %s5612_s7, %s5613_s8  }
  0x14   :  { %s5614_s11 = smov [#allocation2]   ;;  %s5515_s15 = scalar_lea.hbm %s6170_s2, 12288 }
  0x15   :  { %s24_s12 = sshll.u32 %s5614_s11, 4  ;;  %p5516_p8 = scmp.ne.s32.totalorder %s6170_s2, %s5515_s15  ;;  %s25_s12 = int_to_ptr.vmem [resolvable:$true] %s24_s12 }
  0x16   :  { %p5519_p9 = scmp.lt.u32.totalorder %s5515_s15, %s6170_s2 }
  0x18   :  { %p5521_p10 = pnand %p5519_p9, %p5516_p8 }
  0x1a   :  { %5524 = shalt.err (!%p5521_p10)
}
  0x1b   :  { %s5525_s20 = scalar_lea.vmem %s25_s12, 12288  ;;  %p5530_p12 = scmp.lt.s32.totalorder %s25_s12, %s25_s12 }
  0x1c   :  { %p5526_p11 = scmp.ne.s32.totalorder %s25_s12, %s5525_s20  ;;  %p5531_p13 = scmp.lt.s32.totalorder %s5525_s20, %s5525_s20 }
  0x1e   :  { %p5532_p0 = por %p5531_p13, %p5530_p12 }
  0x20   :  { %p5533_p1 = pnand %p5532_p0, %p5526_p11 }
  0x22   :  { %5536 = shalt.err (!%p5533_p1)
}
  0x23   :  { %s5615_s3 = smov 384   ;;  %s5616_s21 = smov 24  }
  0x24   :  { %30 = dma.hbm_to_vmem [thread:$0]  %s6170_s2, 12288, %s25_s12, [#allocation3], %s5615_s3, %s5615_s3, %s5616_s21  }
  0x25   :  { %s5617_s24 = smov [#allocation7]   ;;  %s5618_s26 = smov [#allocation8]  }
  0x26   :  { %s48_s25 = sshll.u32 %s5617_s24, 4  ;;  %s60_s27 = sshll.u32 %s5618_s26, 4  ;;  %s49_s25 = int_to_ptr.vmem [resolvable:$true] %s48_s25  ;;  %s5688_s27 = int_to_ptr.vmem [resolvable:$true] %s60_s27 }
  0x27   :  { %s5537_s30 = scalar_lea.hbm %s6172_s4, 4096 }
  0x28   :  { %p5538_p2 = scmp.ne.s32.totalorder %s6172_s4, %s5537_s30  ;;  %p5541_p3 = scmp.lt.u32.totalorder %s5537_s30, %s6172_s4 }
  0x2a   :  { %p5543_p4 = pnand %p5541_p3, %p5538_p2 }
  0x2c   :  { %5546 = shalt.err (!%p5543_p4)
}
  0x2d   :  { %s5547_s2 = scalar_lea.vmem %s49_s25, 4096  ;;  %p5552_p6 = scmp.lt.s32.totalorder %s49_s25, %s49_s25 }
  0x2e   :  { %p5548_p5 = scmp.ne.s32.totalorder %s49_s25, %s5547_s2  ;;  %p5553_p7 = scmp.lt.s32.totalorder %s5547_s2, %s5547_s2 }
  0x30   :  { %p5554_p8 = por %p5553_p7, %p5552_p6 }
  0x32   :  { %p5555_p9 = pnand %p5554_p8, %p5548_p5 }
  0x34   :  { %5558 = shalt.err (!%p5555_p9)
}
  0x35   :  { %54 = dma.hbm_to_vmem [thread:$0]  %s6172_s4, 4096, %s49_s25, [#allocation6], %s5612_s7, %s5612_s7, %s5613_s8  }
  0x36   :  { %s5559_s17 = scalar_lea.hbm %s6173_s5, 4096 }
  0x37   :  { %p5560_p10 = scmp.ne.s32.totalorder %s6173_s5, %s5559_s17  ;;  %p5563_p11 = scmp.lt.u32.totalorder %s5559_s17, %s6173_s5 }
  0x39   :  { %p5565_p12 = pnand %p5563_p11, %p5560_p10 }
  0x3b   :  { %5568 = shalt.err (!%p5565_p12)
}
  0x3c   :  { %s5569_s21 = scalar_lea.vmem %s5688_s27, 4096  ;;  %p5574_p0 = scmp.lt.s32.totalorder %s5688_s27, %s5688_s27 }
  0x3d   :  { %p5570_p13 = scmp.ne.s32.totalorder %s5688_s27, %s5569_s21  ;;  %p5575_p1 = scmp.lt.s32.totalorder %s5569_s21, %s5569_s21 }
  0x3f   :  { %p5576_p2 = por %p5575_p1, %p5574_p0 }
  0x41   :  { %p5577_p3 = pnand %p5576_p2, %p5570_p13 }
  0x43   :  { %5580 = shalt.err (!%p5577_p3)
}
  0x44   :  { %66 = dma.hbm_to_vmem [thread:$0]  %s6173_s5, 4096, %s5688_s27, [#allocation9], %s5612_s7, %s5612_s7, %s5613_s8  }
  0x45   :  { %5603 = dma.done.wait [#allocation3], 12288  }
  0x46   :  { %5604 = vsyncadd [#allocation3], 4294955008 }
  0x47   :  { %5605 = dma.done.wait [#allocation6], 5120  }
  0x48   :  { %5606 = vsyncadd [#allocation6], 4294962176 }
  0x49   :  { %5607 = dma.done.wait [#allocation9], 4096  }
  0x4a   :  { %5608 = vsyncadd [#allocation9], 4294963200  ;;  %v5728_v0 = vld [vmem:[%s6168_s0 + $0x8] sm:$0xff]  ;;  %v5733_v1 = vld [vmem:[%s6168_s0] sm:$0xff]  ;;  %v5619_v55 = vmov 0.0   ;;  %vm5620_vm0 = vmmov 0  }
  0x4b   :  { %v90_v2 = vld [vmem:[#allocation2 + $0x8] sm:$0xff]  ;;  %175 = vadd.xlane.f32.xlu1 %v5728_v0  ;;  %173 = vadd.xlane.f32.xlu0 %v5733_v1  ;;  %v180_v3 = vmul.f32 %v5728_v0, %v5728_v0  ;;  %v179_v4 = vmul.f32 %v5733_v1, %v5733_v1  ;;  %v93_v5 = vld [vmem:[#allocation2 + $0x20] sm:$0xff]  ;;  %v92_v7 = vld [vmem:[#allocation2 + $0x18] sm:$0xff]  ;;  %vm429_vm1 = vcmask 64512   ;;  %s5621_s27 = smov 120   ;;  %s5622_s28 = smov 112  }
  0x4c   :  { %v89_v6 = vld [vmem:[#allocation2] sm:$0xff]  ;;  %v5122_v8 = vpack.c.bf16 %v93_v5, %v90_v2  ;;  %v91_v10 = vld [vmem:[#allocation2 + $0x10] sm:$0xff]  ;;  %v94_v11 = vld [vmem:[#allocation2 + $0x28] sm:$0xff]  ;;  %275 = vmatprep.mubr.f32.mxu0 %v5619_v55  ;;  %s5623_s29 = smov 104  }
  0x4d   :  { %v5124_v9 = vpack.c.bf16 %v92_v7, %v89_v6  ;;  %v96_v12 = vld [vmem:[#allocation2 + $0x38] sm:$0xff]  ;;  %v5154_v13 = vpack.c.bf16 %v94_v11, %v91_v10  ;;  %v99_v14 = vld [vmem:[#allocation2 + $0x50] sm:$0xff]  ;;  %v98_v17 = vld [vmem:[#allocation2 + $0x48] sm:$0xff] }
  0x4e   :  { %5123 = vmatprep.subr.bf16.mxu0 %v5122_v8  ;;  %v5126_v15 = vpack.c.bf16 %v99_v14, %v96_v12  ;;  %v95_v16 = vld [vmem:[#allocation2 + $0x30] sm:$0xff]  ;;  %v97_v18 = vld [vmem:[#allocation2 + $0x40] sm:$0xff]  ;;  %v100_v20 = vld [vmem:[#allocation2 + $0x58] sm:$0xff] }
  0x4f   :  { %183 = vadd.xlane.f32.xlu1 %v180_v3  ;;  %181 = vadd.xlane.f32.xlu0 %v179_v4  ;;  %v5128_v19 = vpack.c.bf16 %v98_v17, %v95_v16  ;;  %v5158_v21 = vpack.c.bf16 %v100_v20, %v97_v18  ;;  %v102_v22 = vld [vmem:[#allocation2 + $0x68] sm:$0xff]  ;;  %v105_v23 = vld [vmem:[#allocation2 + $0x80] sm:$0xff]  ;;  %v104_v26 = vld [vmem:[#allocation2 + $0x78] sm:$0xff] }
  0x50   :  { %5125 = vmatpush1.bf16.msra.mxu0 %v5124_v9  ;;  %5155 = vmatprep.subr.bf16.mxu1 %v5154_v13  ;;  %v5130_v24 = vpack.c.bf16 %v105_v23, %v102_v22  ;;  %v101_v25 = vld [vmem:[#allocation2 + $0x60] sm:$0xff]  ;;  %v103_v27 = vld [vmem:[#allocation2 + $0x70] sm:$0xff]  ;;  %v106_v29 = vld [vmem:[#allocation2 + $0x88] sm:$0xff] }
  0x51   :  { %5157 = vmatpush3.bf16.msra.mxu1 %v5154_v13  ;;  %5127 = vmatprep.subr.bf16.mxu0 %v5126_v15  ;;  %v5132_v28 = vpack.c.bf16 %v104_v26, %v101_v25  ;;  %v5162_v30 = vpack.c.bf16 %v106_v29, %v103_v27  ;;  %v108_v31 = vld [vmem:[#allocation2 + $0x98] sm:$0xff]  ;;  %v111_v32 = vld [vmem:[#allocation2 + $0xb0] sm:$0xff]  ;;  %v110_v35 = vld [vmem:[#allocation2 + $0xa8] sm:$0xff]  ;;  %v81_v27 = vlaneseq }
  0x52   :  { %5159 = vmatprep.subr.bf16.mxu1 %v5158_v21  ;;  %v5134_v33 = vpack.c.bf16 %v111_v32, %v108_v31  ;;  %v107_v34 = vld [vmem:[#allocation2 + $0x90] sm:$0xff]  ;;  %v109_v36 = vld [vmem:[#allocation2 + $0xa0] sm:$0xff]  ;;  %v112_v38 = vld [vmem:[#allocation2 + $0xb8] sm:$0xff] }
  0x53   :  { %v5136_v37 = vpack.c.bf16 %v110_v35, %v107_v34  ;;  %v5166_v39 = vpack.c.bf16 %v112_v38, %v109_v36  ;;  %v114_v40 = vld [vmem:[#allocation2 + $0xc8] sm:$0xff]  ;;  %v117_v41 = vld [vmem:[#allocation2 + $0xe0] sm:$0xff]  ;;  %v116_v44 = vld [vmem:[#allocation2 + $0xd8] sm:$0xff] }
  0x54   :  { %5129 = vmatpush1.bf16.msra.mxu0 %v5128_v19  ;;  %v5138_v42 = vpack.c.bf16 %v117_v41, %v114_v40  ;;  %v113_v43 = vld [vmem:[#allocation2 + $0xc0] sm:$0xff]  ;;  %v115_v45 = vld [vmem:[#allocation2 + $0xd0] sm:$0xff]  ;;  %v118_v47 = vld [vmem:[#allocation2 + $0xe8] sm:$0xff] }
  0x55   :  { %5161 = vmatpush3.bf16.msra.mxu1 %v5158_v21  ;;  %5131 = vmatprep.subr.bf16.mxu0 %v5130_v24  ;;  %v5140_v46 = vpack.c.bf16 %v116_v44, %v113_v43  ;;  %v120_v48 = vld [vmem:[#allocation2 + $0xf8] sm:$0xff]  ;;  %v123_v49 = vld [vmem:[#allocation2 + $0x110] sm:$0xff]  ;;  %v5170_v50 = vpack.c.bf16 %v118_v47, %v115_v45  ;;  %v122_v53 = vld [vmem:[#allocation2 + $0x108] sm:$0xff] }
  0x56   :  { %5163 = vmatprep.subr.bf16.mxu1 %v5162_v30  ;;  %v5142_v51 = vpack.c.bf16 %v123_v49, %v120_v48  ;;  %v119_v52 = vld [vmem:[#allocation2 + $0xf0] sm:$0xff]  ;;  %v121_v54 = vld [vmem:[#allocation2 + $0x100] sm:$0xff]  ;;  %v124_v57 = vld [vmem:[#allocation2 + $0x118] sm:$0xff] }
  0x57   :  { %v5144_v56 = vpack.c.bf16 %v122_v53, %v119_v52  ;;  %v126_v58 = vld [vmem:[#allocation2 + $0x128] sm:$0xff]  ;;  %v129_v59 = vld [vmem:[#allocation2 + $0x140] sm:$0xff]  ;;  %v5174_v60 = vpack.c.bf16 %v124_v57, %v121_v54  ;;  %v128_v63 = vld [vmem:[#allocation2 + $0x138] sm:$0xff] }
  0x58   :  { %5133 = vmatpush1.bf16.msra.mxu0 %v5132_v28  ;;  %v5146_v61 = vpack.c.bf16 %v129_v59, %v126_v58  ;;  %v125_v62 = vld [vmem:[#allocation2 + $0x120] sm:$0xff]  ;;  %v127_v2 = vld [vmem:[#allocation2 + $0x130] sm:$0xff]  ;;  %v130_v3 = vld [vmem:[#allocation2 + $0x148] sm:$0xff] }
  0x59   :  { %5165 = vmatpush3.bf16.msra.mxu1 %v5162_v30  ;;  %5135 = vmatprep.subr.bf16.mxu0 %v5134_v33  ;;  %v132_v4 = vld [vmem:[#allocation2 + $0x158] sm:$0xff]  ;;  %v135_v5 = vld [vmem:[#allocation2 + $0x170] sm:$0xff]  ;;  %v5178_v6 = vpack.c.bf16 %v130_v3, %v127_v2  ;;  %v5148_v7 = vpack.c.bf16 %v128_v63, %v125_v62  ;;  %v133_v8 = vld [vmem:[#allocation2 + $0x160] sm:$0xff]  ;;  %v5745_v30 = vshrl.u32 %v81_v27, 7 }
  0x5a   :  { %5167 = vmatprep.subr.bf16.mxu1 %v5166_v39  ;;  %v136_v9 = vld [vmem:[#allocation2 + $0x178] sm:$0xff]  ;;  %v5150_v10 = vpack.c.bf16 %v135_v5, %v132_v4  ;;  %v131_v11 = vld [vmem:[#allocation2 + $0x150] sm:$0xff]  ;;  %v134_v12 = vld [vmem:[#allocation2 + $0x168] sm:$0xff] }
  0x5b   :  { %v5182_v13 = vpack.c.bf16 %v136_v9, %v133_v8  ;;  %v5152_v14 = vpack.c.bf16 %v134_v12, %v131_v11  ;;  %v5748_v31 = vsub.s32 0, %v5745_v30  ;;  %v5753_v32 = vld [vmem:[%s6169_s1] sm:$0xff]  ;;  %v5756_v33 = vsub.s32 1, %v5745_v30 }
  0x5c   :  { %5137 = vmatpush1.bf16.msra.mxu0 %v5136_v37  ;;  %v385_v47 = vsub.s32 5, %v5745_v30  ;;  %v405_v4 = vsub.s32 6, %v5745_v30 }
  0x5d   :  { %5169 = vmatpush3.bf16.msra.mxu1 %v5166_v39  ;;  %5139 = vmatprep.subr.bf16.mxu0 %v5138_v42  ;;  %v202_v35 = vrot.slane %v5753_v32, %v5748_v31  ;;  %v208_v39 = vrot.slane %v5753_v32, %v5756_v33 }
  0x5e   :  { %5171 = vmatprep.subr.bf16.mxu1 %v5170_v50  ;;  %v386_v49 = vrot.slane %v5753_v32, %v385_v47 }
  0x60   :  { %5141 = vmatpush1.bf16.msra.mxu0 %v5140_v46  ;;  %v365_v46 = vsub.s32 4, %v5745_v30 }
  0x61   :  { %5143 = vmatprep.subr.bf16.mxu0 %v5142_v51  ;;  %5173 = vmatpush3.bf16.msra.mxu1 %v5170_v50 }
  0x62   :  { %5175 = vmatprep.subr.bf16.mxu1 %v5174_v60  ;;  %v366_v48 = vrot.slane %v5753_v32, %v365_v46 }
  0x64   :  { %5145 = vmatpush1.bf16.msra.mxu0 %v5144_v56 }
  0x65   :  { %5147 = vmatprep.subr.bf16.mxu0 %v5146_v61  ;;  %5177 = vmatpush3.bf16.msra.mxu1 %v5174_v60 }
  0x66   :  { %5179 = vmatprep.subr.bf16.mxu1 %v5178_v6 }
  0x68   :  { %5149 = vmatpush1.bf16.msra.mxu0 %v5148_v7  ;;  %v406_v7 = vrot.slane %v5753_v32, %v405_v4 }
  0x69   :  { %5151 = vmatprep.subr.bf16.mxu0 %v5150_v10  ;;  %5181 = vmatpush3.bf16.msra.mxu1 %v5178_v6 }
  0x6a   :  { %5183 = vmatprep.subr.bf16.mxu1 %v5182_v13 }
  0x6c   :  { %5153 = vmatpush1.bf16.msra.mxu0 %v5152_v14 }
  0x6d   :  { %4772 = vmatprep.subr.mxu0 %v5619_v55  ;;  %5185 = vmatpush3.bf16.msra.mxu1 %v5182_v13 }
  0x6e   :  { %4747 = vmatprep.subr.mxu1 %v5619_v55 }
  0xd8   :  { %v176_v15 = vpop.xlane.xlu1 %175  ;;  %v174_v16 = vpop.xlane.xlu0 %173 }
  0xd9   :  { %v178_v17 = vmul.f32 0.03125, %v176_v15  ;;  %v177_v18 = vmul.f32 0.03125, %v174_v16  ;;  %v84_v15 = vand.u32 127, %v81_v27  ;;  %v5624_v16 = vmov -1e+30  }
  0xdb   :  { %v188_v19 = vmul.f32 %v178_v17, %v178_v17  ;;  %v187_v22 = vmul.f32 %v177_v18, %v177_v18  ;;  %v192_v34 = vsub.f32 %v5728_v0, %v178_v17  ;;  %v191_v37 = vsub.f32 %v5733_v1, %v177_v18 }
  0xdc   :  { %v184_v20 = vpop.xlane.xlu1 %183  ;;  %v182_v21 = vpop.xlane.xlu0 %181  ;;  %vm85_vm2 = vcmp.ge.s32.totalorder %v5745_v30, %v84_v15 }
  0xdd   :  { %v186_v23 = vmul.f32 0.03125, %v184_v20  ;;  %v185_v24 = vmul.f32 0.03125, %v182_v21  ;;  %v5846_v17 = vsel %vm85_vm2, 0.0, %v5624_v16 }
  0xdf   :  { %v190_v25 = vsub.f32 %v186_v23, %v188_v19  ;;  %v189_v26 = vsub.f32 %v185_v24, %v187_v22 }
  0xe1   :  { %v194_v28 = vadd.f32 1e-05, %v190_v25  ;;  %v193_v29 = vadd.f32 1e-05, %v189_v26 }
  0xe3   :  { %5405 = vrsqrt.f32 %v194_v28 }
  0xe4   :  { %5407 = vrsqrt.f32 %v193_v29 }
  0xed   :  { %v5406_v36 = vpop.eup %5405 }
  0xee   :  { %v5408_v38 = vpop.eup %5407  ;;  %v198_v40 = vmul.f32 %v5406_v36, %v192_v34 }
  0xef   :  { %v197_v41 = vmul.f32 %v5408_v38, %v191_v37 }
  0xf0   :  { %v204_v42 = vmul.f32 %v202_v35, %v198_v40 }
  0xf1   :  { %v203_v43 = vmul.f32 %v202_v35, %v197_v41 }
  0xf2   :  { %v210_v44 = vadd.f32 %v208_v39, %v204_v42 }
  0xf3   :  { %v209_v45 = vadd.f32 %v208_v39, %v203_v43 }
  0xf5   :  { %276 = vmatmul.mubr.f32.vlgmr.msra.gmra.mrb[0].mxu0 %v209_v45  ;;  %4744 = vmatprep.mubr.f32.mxu1 %v209_v45 }
  0xf6   :  { %4745 = vmatmul.mubr.f32.vlgmr.msra.gmra.mrb[0].mxu1 %v210_v44  ;;  %281 = vmatprep.mubr.f32.mxu0 %v5619_v55 }
  0xf7   :  { %4749 = vmatprep.mubr.msk.f32.mxu1 %vm5620_vm0, %v5619_v55 }
  0xf9   :  { %282 = vmatmul.mubr.f32.gmra.mrb[2].mxu0 %v210_v44 }
  0xfa   :  { %4774 = vmatprep.mubr.msk.f32.mxu0 %vm5620_vm0, %v5619_v55 }
 0x1c8   :  { %v277_v50 = vpop.f32.mrb[0].mxu0 }
 0x1c9   :  { %v367_v51 = vadd.f32 %v366_v48, %v277_v50  ;;  %v279_v52 = vpop.f32.mrb[1].mxu0  ;;  %v5777_v53 = vpop.f32.mrb[0].mxu1 }
 0x1ca   :  { %v387_v54 = vadd.f32 %v386_v49, %v279_v52  ;;  %v354_v56 = vpop.f32.mrb[1].mxu1  ;;  %v5837_v13 = vadd.f32 %v5777_v53, %v406_v7 }
 0x1cb   :  { %371 = vrot.lane.b32.xlu1 %v367_v51, %s5621_s27  ;;  %v5824_v10 = vadd.f32 %v406_v7, %v354_v56 }
 0x1cc   :  { %391 = vrot.lane.b32.xlu0 %v387_v54, %s5621_s27  ;;  %v283_v57 = vpop.f32.mrb[2].mxu0  ;;  %4748 = vmatpush3.xpose.msk.msra.mxu1 %vm429_vm1, %v387_v54 }
 0x1cd   :  { %v285_v58 = vpop.f32.mrb[3].mxu0  ;;  %4752 = vmatprep.subr.mxu1 %v5619_v55  ;;  %v368_v60 = vadd.f32 %v366_v48, %v283_v57 }
 0x1ce   :  { %v388_v59 = vadd.f32 %v386_v49, %v285_v58 }
 0x1cf   :  { %4750 = vmatmul.mubr.msk.f32.vlgmr.msra.gmra.mrb[2].mxu1 %vm429_vm1, %v367_v51 }
 0x1d0   :  { %395 = vrot.lane.b32.xlu0 %v387_v54, %s5622_s28  ;;  %393 = vrot.lane.b32.xlu1 %v388_v59, %s5621_s27 }
 0x1d1   :  { %4753 = vmatpush3.xpose.msk.msra.mxu1 %vm429_vm1, %v388_v59  ;;  %4754 = vmatprep.mubr.msk.f32.mxu1 %vm5620_vm0, %v5619_v55 }
 0x1d2   :  { %4757 = vmatprep.subr.mxu1 %v5619_v55 }
 0x1d4   :  { %4755 = vmatmul.mubr.msk.f32.vlgmr.msra.gmra.mrb[4].mxu1 %vm429_vm1, %v368_v60  ;;  %375 = vrot.lane.b32.xlu0 %v367_v51, %s5622_s28 }
 0x1d5   :  { %373 = vrot.lane.b32.xlu1 %v368_v60, %s5621_s27  ;;  %4759 = vmatprep.mubr.msk.f32.mxu1 %vm5620_vm0, %v5619_v55 }
 0x1d8   :  { %399 = vrot.lane.b32.xlu0 %v387_v54, %s5623_s29 }
 0x1d9   :  { %397 = vrot.lane.b32.xlu1 %v388_v59, %s5622_s28 }
 0x1dc   :  { %379 = vrot.lane.b32.xlu0 %v367_v51, %s5623_s29 }
 0x1dd   :  { %377 = vrot.lane.b32.xlu1 %v368_v60, %s5622_s28 }
 0x1e1   :  { %401 = vrot.lane.b32.xlu1 %v388_v59, %s5623_s29 }
 0x1e5   :  { %381 = vrot.lane.b32.xlu1 %v368_v60, %s5623_s29 }
 0x23d   :  { %v372_v61 = vpop.permute.xlu1 %371 }
 0x23e   :  { %v392_v62 = vpop.permute.xlu0 %391 }
 0x23f   :  { %4758 = vmatpush3.xpose.msk.msra.mxu1 %vm429_vm1, %v392_v62 }
 0x240   :  { %4762 = vmatprep.subr.mxu1 %v5619_v55 }
 0x242   :  { %v396_v63 = vpop.permute.xlu0 %395  ;;  %v394_v2 = vpop.permute.xlu1 %393  ;;  %4760 = vmatmul.mubr.msk.f32.vlgmr.msra.gmra.mrb[6].mxu1 %vm429_vm1, %v372_v61 }
 0x243   :  { %4763 = vmatpush3.xpose.msk.msra.mxu1 %vm429_vm1, %v394_v2  ;;  %4764 = vmatprep.mubr.msk.f32.mxu1 %vm5620_vm0, %v5619_v55 }
 0x244   :  { %4767 = vmatprep.subr.mxu1 %v5619_v55 }
 0x246   :  { %v376_v3 = vpop.permute.xlu0 %375 }
 0x247   :  { %v374_v5 = vpop.permute.xlu1 %373 }
 0x248   :  { %4765 = vmatmul.mubr.msk.f32.vlgmr.msra.gmra.mrb[8].mxu1 %vm429_vm1, %v374_v5 }
 0x249   :  { %4768 = vmatpush3.xpose.msk.msra.mxu1 %vm429_vm1, %v396_v63  ;;  %4769 = vmatprep.mubr.msk.f32.mxu1 %vm5620_vm0, %v5619_v55 }
 0x24a   :  { %v400_v6 = vpop.permute.xlu0 %399  ;;  %4777 = vmatprep.subr.mxu1 %v5619_v55 }
 0x24b   :  { %v398_v8 = vpop.permute.xlu1 %397 }
 0x24c   :  { %4770 = vmatmul.mubr.msk.f32.vlgmr.msra.gmra.mrb[10].mxu1 %vm429_vm1, %v376_v3  ;;  %4773 = vmatpush3.xpose.msk.msra.mxu0 %vm429_vm1, %v398_v8 }
 0x24d   :  { %4778 = vmatpush3.xpose.msk.msra.mxu1 %vm429_vm1, %v400_v6  ;;  %4779 = vmatprep.mubr.msk.f32.mxu1 %vm5620_vm0, %v5619_v55 }
 0x24e   :  { %v380_v9 = vpop.permute.xlu0 %379  ;;  %4787 = vmatprep.subr.mxu1 %v5619_v55  ;;  %4782 = vmatprep.subr.mxu0 %v5619_v55 }
 0x24f   :  { %v378_v11 = vpop.permute.xlu1 %377 }
 0x250   :  { %4775 = vmatmul.mubr.msk.f32.vlgmr.msra.gmra.mrb[4].mxu0 %vm429_vm1, %v378_v11  ;;  %4780 = vmatmul.mubr.msk.f32.vlgmr.msra.gmra.mrb[12].mxu1 %vm429_vm1, %v380_v9 }
 0x251   :  { %4788 = vmatpush3.msra.mxu1 %v5824_v10  ;;  %4784 = vmatprep.mubr.msk.f32.mxu0 %vm5620_vm0, %v5619_v55 }
 0x252   :  { %4789 = vmatprep.mubr.msk.f32.mxu1 %vm5620_vm0, %v5619_v55  ;;  %4797 = vmatprep.subr.mxu1 %v5619_v55 }
 0x253   :  { %v402_v12 = vpop.permute.xlu1 %401 }
 0x254   :  { %4783 = vmatpush3.xpose.msk.msra.mxu0 %vm429_vm1, %v402_v12 }
 0x255   :  { %4792 = vmatprep.subr.mxu0 %v5619_v55 }
 0x257   :  { %v382_v14 = vpop.permute.xlu1 %381 }
 0x258   :  { %4785 = vmatmul.mubr.msk.f32.vlgmr.msra.gmra.mrb[6].mxu0 %vm429_vm1, %v382_v14 }
 0x259   :  { %4793 = vmatpush3.msra.mxu0 %v5837_v13  ;;  %4794 = vmatprep.mubr.msk.f32.mxu0 %vm5620_vm0, %v5619_v55 }
 0x25a   :  { %4802 = vmatprep.subr.mxu0 %v5619_v55 }
 0x2a2   :  { %v500_v18 = vpop.f32.mrb[2].mxu1 }
 0x2a3   :  { %v501_v19 = vadd.f32 %v500_v18, %v5846_v17  ;;  %v4751_v20 = vpop.f32.mrb[3].mxu1 }
 0x2a5   :  { %v1022_v21 = vsel %vm429_vm1, %v501_v19, -inf }
 0x2a6   :  { %1023 = vmax.xlane.f32.xlu0 %v1022_v21 }
 0x2a7   :  { %v574_v22 = vpop.f32.mrb[4].mxu1 }
 0x2a8   :  { %v575_v23 = vadd.f32 %v574_v22, %v5846_v17  ;;  %v4756_v24 = vpop.f32.mrb[5].mxu1 }
 0x2aa   :  { %v1025_v25 = vsel %vm429_vm1, %v575_v23, -inf }
 0x2ab   :  { %1026 = vmax.xlane.f32.xlu1 %v1025_v25 }
 0x315   :  { %v648_v26 = vpop.f32.mrb[6].mxu1 }
 0x316   :  { %v649_v27 = vadd.f32 %v648_v26, %v5846_v17  ;;  %v4761_v28 = vpop.f32.mrb[7].mxu1 }
 0x318   :  { %v1028_v29 = vsel %vm429_vm1, %v649_v27, -inf }
 0x319   :  { %1029 = vmax.xlane.f32.xlu0 %v1028_v29 }
 0x31b   :  { %v722_v34 = vpop.f32.mrb[8].mxu1 }
 0x31c   :  { %v723_v35 = vadd.f32 %v722_v34, %v5846_v17  ;;  %v4766_v36 = vpop.f32.mrb[9].mxu1 }
 0x31e   :  { %v1031_v37 = vsel %vm429_vm1, %v723_v35, -inf }
 0x31f   :  { %1032 = vmax.xlane.f32.xlu0 %v1031_v37  ;;  %v796_v38 = vpop.f32.mrb[10].mxu1 }
 0x320   :  { %v797_v39 = vadd.f32 %v796_v38, %v5846_v17  ;;  %v4771_v40 = vpop.f32.mrb[11].mxu1 }
 0x322   :  { %v1034_v41 = vsel %vm429_vm1, %v797_v39, -inf }
 0x323   :  { %v870_v42 = vpop.f32.mrb[4].mxu0  ;;  %1035 = vmax.xlane.f32.xlu0 %v1034_v41  ;;  %v944_v43 = vpop.f32.mrb[12].mxu1 }
 0x324   :  { %v871_v44 = vadd.f32 %v870_v42, %v5846_v17  ;;  %v945_v45 = vadd.f32 %v944_v43, %v5846_v17  ;;  %v4776_v48 = vpop.f32.mrb[5].mxu0  ;;  %v4781_v49 = vpop.f32.mrb[13].mxu1 }
 0x326   :  { %v1037_v50 = vsel %vm429_vm1, %v871_v44, -inf  ;;  %v1040_v51 = vsel %vm429_vm1, %v945_v45, -inf }
 0x327   :  { %1038 = vmax.xlane.f32.xlu1 %v1037_v50  ;;  %1041 = vmax.xlane.f32.xlu0 %v1040_v51 }
 0x32b   :  { %v1018_v52 = vpop.f32.mrb[6].mxu0 }
 0x32c   :  { %v1019_v53 = vadd.f32 %v1018_v52, %v5846_v17  ;;  %v4786_v54 = vpop.f32.mrb[7].mxu0 }
 0x32e   :  { %v1043_v56 = vsel %vm429_vm1, %v1019_v53, -inf }
 0x32f   :  { %1044 = vmax.xlane.f32.xlu1 %v1043_v56 }
 0x333   :  { %v1024_v57 = vpop.xlane.xlu0 %1023 }
 0x334   :  { %v1046_v58 = vsub.f32 %v501_v19, %v1024_v57 }
 0x336   :  { %v1054_v59 = vmul.f32 1.442695, %v1046_v58 }
 0x338   :  { %5409 = vpow2.f32 %v1054_v59  ;;  %v1027_v60 = vpop.xlane.xlu1 %1026 }
 0x339   :  { %v1047_v61 = vsub.f32 %v575_v23, %v1027_v60 }
 0x33b   :  { %v1056_v62 = vmul.f32 1.442695, %v1047_v61 }
 0x33d   :  { %5411 = vpow2.f32 %v1056_v62 }
 0x342   :  { %v5410_v63 = vpop.eup %5409 }
 0x343   :  { %v1070_v2 = vsel %vm429_vm1, %v5410_v63, 0.0 }
 0x344   :  { %1071 = vadd.xlane.f32.xlu0 %v1070_v2 }
 0x347   :  { %v5412_v3 = vpop.eup %5411 }
 0x348   :  { %v1073_v5 = vsel %vm429_vm1, %v5412_v3, 0.0 }
 0x349   :  { %1074 = vadd.xlane.f32.xlu1 %v1073_v5 }
 0x35a   :  { %413 = vrot.lane.b32.xlu1 %v5837_v13, %s5621_s27 }
 0x35e   :  { %417 = vrot.lane.b32.xlu1 %v5824_v10, %s5622_s28 }
 0x3a6   :  { %v1030_v6 = vpop.xlane.xlu0 %1029 }
 0x3a7   :  { %v1048_v7 = vsub.f32 %v649_v27, %v1030_v6 }
 0x3a9   :  { %v1058_v8 = vmul.f32 1.442695, %v1048_v7 }
 0x3ab   :  { %5413 = vpow2.f32 %v1058_v8 }
 0x3ac   :  { %v1033_v9 = vpop.xlane.xlu0 %1032 }
 0x3ad   :  { %v1049_v11 = vsub.f32 %v723_v35, %v1033_v9 }
 0x3af   :  { %v1060_v12 = vmul.f32 1.442695, %v1049_v11 }
 0x3b0   :  { %v1036_v19 = vpop.xlane.xlu0 %1035 }
 0x3b1   :  { %5415 = vpow2.f32 %v1060_v12  ;;  %v1050_v24 = vsub.f32 %v797_v39, %v1036_v19 }
 0x3b3   :  { %v1062_v26 = vmul.f32 1.442695, %v1050_v24 }
 0x3b4   :  { %v1042_v20 = vpop.xlane.xlu0 %1041  ;;  %v1039_v21 = vpop.xlane.xlu1 %1038 }
 0x3b5   :  { %v5414_v14 = vpop.eup %5413  ;;  %v1052_v27 = vsub.f32 %v945_v45, %v1042_v20  ;;  %v1051_v29 = vsub.f32 %v871_v44, %v1039_v21 }
 0x3b6   :  { %v1076_v15 = vsel %vm429_vm1, %v5414_v14, 0.0 }
 0x3b7   :  { %1077 = vadd.xlane.f32.xlu0 %v1076_v15  ;;  %v1066_v35 = vmul.f32 1.442695, %v1052_v27  ;;  %v1064_v36 = vmul.f32 1.442695, %v1051_v29  ;;  %v138_v15 = vld [vmem:[#allocation5 + $0x8] sm:$0xff]  ;;  %v140_v27 = vld [vmem:[#allocation5 + $0x18] sm:$0xff] }
 0x3bb   :  { %v5871_v16 = vpop.eup %5415 }
 0x3bc   :  { %v1079_v18 = vsel %vm429_vm1, %v5871_v16, 0.0  ;;  %v1045_v23 = vpop.xlane.xlu1 %1044 }
 0x3bd   :  { %1080 = vadd.xlane.f32.xlu1 %v1079_v18  ;;  %v1053_v37 = vsub.f32 %v1019_v53, %v1045_v23 }
 0x3bf   :  { %v1068_v39 = vmul.f32 1.442695, %v1053_v37 }
 0x3cd   :  { %411 = vrot.lane.b32.xlu0 %v5824_v10, %s5621_s27 }
 0x3ce   :  { %419 = vrot.lane.b32.xlu1 %v5837_v13, %s5622_s28 }
 0x3d1   :  { %v1072_v22 = vpop.xlane.xlu0 %1071 }
 0x3d2   :  { %5417 = vrcp.f32 %v1072_v22 }
 0x3d6   :  { %v1075_v25 = vpop.xlane.xlu1 %1074 }
 0x3d7   :  { %5419 = vrcp.f32 %v1075_v25  ;;  %v139_v25 = vld [vmem:[#allocation5 + $0x10] sm:$0xff] }
 0x3d8   :  { %5421 = vpow2.f32 %v1062_v26 }
 0x3d9   :  { %5423 = vpow2.f32 %v1066_v35 }
 0x3da   :  { %5425 = vpow2.f32 %v1064_v36  ;;  %v414_v41 = vpop.permute.xlu1 %413 }
 0x3db   :  { %5427 = vpow2.f32 %v1068_v39  ;;  %v2034_v39 = vsub.s32 7, %v5745_v30 }
 0x3dc   :  { %v5418_v28 = vpop.eup %5417 }
 0x3dd   :  { %v1110_v34 = vmul.f32 %v5418_v28, %v5410_v63 }
 0x3de   :  { %v418_v53 = vpop.permute.xlu1 %417 }
 0x3df   :  { %4790 = vmatmul.mubr.msk.f32.vlgmr.msra.gmra.mrb[14].mxu1 %vm429_vm1, %v1110_v34 }
 0x3e0   :  { %4799 = vmatprep.mubr.msk.f32.mxu1 %vm5620_vm0, %v5619_v55 }
 0x3e1   :  { %v5420_v38 = vpop.eup %5419 }
 0x3e2   :  { %v1111_v40 = vmul.f32 %v5420_v38, %v5412_v3  ;;  %v5422_v42 = vpop.eup %5421 }
 0x3e3   :  { %v1082_v43 = vsel %vm429_vm1, %v5422_v42, 0.0  ;;  %v5424_v44 = vpop.eup %5423 }
 0x3e4   :  { %4795 = vmatmul.mubr.msk.f32.vlgmr.msra.gmra.mrb[8].mxu0 %vm429_vm1, %v1111_v40  ;;  %v5426_v45 = vpop.eup %5425  ;;  %v1088_v48 = vsel %vm429_vm1, %v5424_v44, 0.0 }
 0x3e5   :  { %4803 = vmatpush3.msra.mxu0 %v414_v41  ;;  %4804 = vmatprep.mubr.msk.f32.mxu0 %vm5620_vm0, %v5619_v55  ;;  %v1085_v49 = vsel %vm429_vm1, %v5426_v45, 0.0  ;;  %v5428_v50 = vpop.eup %5427  ;;  %v2035_v41 = vrot.slane %v5753_v32, %v2034_v39 }
 0x3e6   :  { %4812 = vmatprep.subr.mxu0 %v5619_v55  ;;  %v1091_v51 = vsel %vm429_vm1, %v5428_v50, 0.0 }
 0x3ec   :  { %1083 = vadd.xlane.f32.xlu0 %v1082_v43 }
 0x3f0   :  { %1089 = vadd.xlane.f32.xlu0 %v1088_v48 }
 0x3f2   :  { %1086 = vadd.xlane.f32.xlu1 %v1085_v49 }
 0x3f6   :  { %1092 = vadd.xlane.f32.xlu1 %v1091_v51 }
 0x406   :  { %423 = vrot.lane.b32.xlu0 %v5824_v10, %s5623_s29 }
 0x407   :  { %425 = vrot.lane.b32.xlu1 %v5837_v13, %s5623_s29 }
 0x444   :  { %v1078_v52 = vpop.xlane.xlu0 %1077 }
 0x445   :  { %5429 = vrcp.f32 %v1078_v52  ;;  %v142_v52 = vld [vmem:[#allocation7 + $0x8] sm:$0xff] }
 0x448   :  { %v412_v54 = vpop.permute.xlu0 %411 }
 0x449   :  { %4798 = vmatpush3.msra.mxu1 %v412_v54  ;;  %v144_v54 = vld [vmem:[#allocation7 + $0x18] sm:$0xff] }
 0x44a   :  { %v1081_v56 = vpop.xlane.xlu1 %1080  ;;  %4807 = vmatprep.subr.mxu1 %v5619_v55 }
 0x44b   :  { %5431 = vrcp.f32 %v1081_v56 }
 0x44e   :  { %v420_v59 = vpop.permute.xlu1 %419 }
 0x44f   :  { %v5430_v57 = vpop.eup %5429 }
 0x450   :  { %v1112_v58 = vmul.f32 %v5430_v57, %v5414_v14  ;;  %v145_v57 = vld [vmem:[#allocation7 + $0x20] sm:$0xff] }
 0x452   :  { %4800 = vmatmul.mubr.msk.f32.vlgmr.msra.gmra.mrb[16].mxu1 %vm429_vm1, %v1112_v58  ;;  %v146_v58 = vld [vmem:[#allocation7 + $0x28] sm:$0xff] }
 0x453   :  { %4808 = vmatpush3.msra.mxu1 %v418_v53  ;;  %4809 = vmatprep.mubr.msk.f32.mxu1 %vm5620_vm0, %v5619_v55 }
 0x454   :  { %4817 = vmatprep.subr.mxu1 %v5619_v55 }
 0x455   :  { %v5432_v10 = vpop.eup %5431 }
 0x456   :  { %v1113_v13 = vmul.f32 %v5432_v10, %v5871_v16  ;;  %v137_v16 = vld [vmem:[#allocation5] sm:$0xff]  ;;  %v5194_v10 = vpack.c.bf16 %v146_v58, %v145_v57  ;;  %v162_v57 = vld [vmem:[#allocation8 + $0x28] sm:$0xff] }
 0x458   :  { %4805 = vmatmul.mubr.msk.f32.vlgmr.msra.gmra.mrb[10].mxu0 %vm429_vm1, %v1113_v13  ;;  %v147_v13 = vld [vmem:[#allocation7 + $0x30] sm:$0xff] }
 0x459   :  { %4813 = vmatpush3.msra.mxu0 %v420_v59  ;;  %4814 = vmatprep.mubr.msk.f32.mxu0 %vm5620_vm0, %v5619_v55  ;;  %v148_v59 = vld [vmem:[#allocation7 + $0x38] sm:$0xff] }
 0x45a   :  { %4822 = vmatprep.subr.mxu0 %v5619_v55 }
 0x479   :  { %v1084_v60 = vpop.xlane.xlu0 %1083 }
 0x47a   :  { %5433 = vrcp.f32 %v1084_v60  ;;  %v5198_v60 = vpack.c.bf16 %v148_v59, %v147_v13  ;;  %v164_v13 = vld [vmem:[#allocation8 + $0x38] sm:$0xff] }
 0x47d   :  { %v1090_v61 = vpop.xlane.xlu0 %1089 }
 0x47e   :  { %5435 = vrcp.f32 %v1090_v61  ;;  %v149_v61 = vld [vmem:[#allocation7 + $0x40] sm:$0xff] }
 0x47f   :  { %v1087_v62 = vpop.xlane.xlu1 %1086 }
 0x480   :  { %5437 = vrcp.f32 %v1087_v62  ;;  %v150_v62 = vld [vmem:[#allocation7 + $0x48] sm:$0xff] }
 0x481   :  { %v424_v5 = vpop.permute.xlu0 %423 }
 0x483   :  { %v1093_v63 = vpop.xlane.xlu1 %1092 }
 0x484   :  { %v5434_v2 = vpop.eup %5433  ;;  %5439 = vrcp.f32 %v1093_v63  ;;  %v5202_v63 = vpack.c.bf16 %v150_v62, %v149_v61  ;;  %v166_v61 = vld [vmem:[#allocation8 + $0x48] sm:$0xff]  ;;  %v167_v62 = vld [vmem:[#allocation8 + $0x50] sm:$0xff] }
 0x485   :  { %v1114_v3 = vmul.f32 %v5434_v2, %v5422_v42  ;;  %v151_v2 = vld [vmem:[#allocation7 + $0x50] sm:$0xff] }
 0x487   :  { %4810 = vmatmul.mubr.msk.f32.vlgmr.msra.gmra.mrb[18].mxu1 %vm429_vm1, %v1114_v3  ;;  %v426_v11 = vpop.permute.xlu1 %425  ;;  %v152_v3 = vld [vmem:[#allocation7 + $0x58] sm:$0xff] }
 0x488   :  { %v5436_v6 = vpop.eup %5435  ;;  %4818 = vmatpush3.msra.mxu1 %v424_v5  ;;  %4819 = vmatprep.mubr.msk.f32.mxu1 %vm5620_vm0, %v5619_v55  ;;  %v5206_v5 = vpack.c.bf16 %v152_v3, %v151_v2  ;;  %v168_v2 = vld [vmem:[#allocation8 + $0x58] sm:$0xff] }
 0x489   :  { %v1116_v7 = vmul.f32 %v5436_v6, %v5424_v44  ;;  %4827 = vmatprep.subr.mxu1 %v138_v15  ;;  %v153_v6 = vld [vmem:[#allocation7 + $0x60] sm:$0xff]  ;;  %v5238_v3 = vpack.c.bf16 %v168_v2, %v167_v62 }
 0x48a   :  { %v5438_v8 = vpop.eup %5437 }
 0x48b   :  { %v1115_v9 = vmul.f32 %v5438_v8, %v5426_v45  ;;  %4820 = vmatmul.mubr.msk.f32.vlgmr.msra.gmra.mrb[20].mxu1 %vm429_vm1, %v1116_v7  ;;  %v154_v7 = vld [vmem:[#allocation7 + $0x68] sm:$0xff] }
 0x48c   :  { %4828 = vmatpush3.msra.mxu1 %v138_v15  ;;  %v5210_v8 = vpack.c.bf16 %v154_v7, %v153_v6  ;;  %v170_v6 = vld [vmem:[#allocation8 + $0x68] sm:$0xff] }
 0x48d   :  { %4815 = vmatmul.mubr.msk.f32.vlgmr.msra.gmra.mrb[12].mxu0 %vm429_vm1, %v1115_v9  ;;  %4832 = vmatprep.subr.mxu1 %v137_v16  ;;  %v155_v9 = vld [vmem:[#allocation7 + $0x70] sm:$0xff] }
 0x48e   :  { %v5440_v12 = vpop.eup %5439  ;;  %4823 = vmatpush3.msra.mxu0 %v426_v11  ;;  %4824 = vmatprep.mubr.msk.f32.mxu0 %vm5620_vm0, %v5619_v55  ;;  %v156_v11 = vld [vmem:[#allocation7 + $0x78] sm:$0xff] }
 0x48f   :  { %v1117_v14 = vmul.f32 %v5440_v12, %v5428_v50  ;;  %v5214_v12 = vpack.c.bf16 %v156_v11, %v155_v9  ;;  %v172_v9 = vld [vmem:[#allocation8 + $0x78] sm:$0xff] }
 0x491   :  { %4825 = vmatmul.mubr.msk.f32.vlgmr.msra.gmra.mrb[14].mxu0 %vm429_vm1, %v1117_v14 }
 0x4b2   :  { %v1187_v18 = vpop.f32.mrb[14].mxu1 }
 0x4b3   :  { %v4791_v19 = vpop.f32.mrb[15].mxu1 }
 0x4b7   :  { %v1260_v20 = vpop.f32.mrb[8].mxu0 }
 0x4b8   :  { %v4796_v21 = vpop.f32.mrb[9].mxu0 }
 0x525   :  { %v1333_v22 = vpop.f32.mrb[16].mxu1 }
 0x526   :  { %v4801_v23 = vpop.f32.mrb[17].mxu1  ;;  %4829 = vmatprep.mubr.msk.f32.mxu1 %vm429_vm1, %v1333_v22 }
 0x52b   :  { %v1406_v24 = vpop.f32.mrb[10].mxu0 }
 0x52c   :  { %v4806_v26 = vpop.f32.mrb[11].mxu0  ;;  %4830 = vmatmul.mubr.msk.f32.vlgmr.msra.gmra.mrb[22].mxu1 %vm429_vm1, %v1406_v24 }
 0x52d   :  { %4834 = vmatprep.mubr.msk.f32.mxu1 %vm429_vm1, %v1187_v18  ;;  %4833 = vmatpush3.msra.mxu1 %v137_v16 }
 0x52e   :  { %4837 = vmatprep.subr.mxu1 %v139_v25 }
 0x534   :  { %4835 = vmatmul.mubr.msk.f32.vlgmr.msra.gmra.mrb[22].mxu1 %vm429_vm1, %v1260_v20 }
 0x535   :  { %4838 = vmatpush3.msra.mxu1 %v139_v25 }
 0x536   :  { %4842 = vmatprep.subr.mxu1 %v140_v27 }
 0x55a   :  { %v1479_v28 = vpop.f32.mrb[18].mxu1 }
 0x55b   :  { %v4811_v29 = vpop.f32.mrb[19].mxu1  ;;  %4839 = vmatprep.mubr.msk.f32.mxu1 %vm429_vm1, %v1479_v28 }
 0x55c   :  { %v2066_v29 = vsub.s32 2, %v5745_v30 }
 0x55e   :  { %v1625_v34 = vpop.f32.mrb[20].mxu1 }
 0x55f   :  { %v4821_v35 = vpop.f32.mrb[21].mxu1 }
 0x560   :  { %v1552_v36 = vpop.f32.mrb[12].mxu0 }
 0x561   :  { %v4816_v37 = vpop.f32.mrb[13].mxu0  ;;  %4840 = vmatmul.mubr.msk.f32.vlgmr.msra.gmra.mrb[22].mxu1 %vm429_vm1, %v1552_v36  ;;  %v2067_v36 = vrot.slane %v5753_v32, %v2066_v29 }
 0x562   :  { %4843 = vmatpush3.msra.mxu1 %v140_v27  ;;  %4844 = vmatprep.mubr.msk.f32.mxu1 %vm429_vm1, %v1625_v34  ;;  %v2072_v34 = vsub.s32 3, %v5745_v30 }
 0x564   :  { %v1698_v38 = vpop.f32.mrb[14].mxu0 }
 0x565   :  { %v4826_v40 = vpop.f32.mrb[15].mxu0 }
 0x566   :  { %v2073_v40 = vrot.slane %v5753_v32, %v2072_v34 }
 0x569   :  { %4845 = vmatmul.mubr.msk.f32.vlgmr.msra.gmra.mrb[22].mxu1 %vm429_vm1, %v1698_v38 }
 0x63c   :  { %v4846_v42 = vpop.f32.mrb[22].mxu1 }
 0x63d   :  { %v2031_v43 = vadd.f32 %v4846_v42, %v5728_v0  ;;  %v2019_v44 = vpop.f32.mrb[23].mxu1  ;;  %v141_v0 = vld [vmem:[#allocation7] sm:$0xff] }
 0x63e   :  { %v2030_v45 = vadd.f32 %v2019_v44, %v5733_v1  ;;  %v5186_v53 = vpack.c.bf16 %v142_v52, %v141_v0  ;;  %v143_v1 = vld [vmem:[#allocation7 + $0x10] sm:$0xff]  ;;  %v157_v0 = vld [vmem:[#allocation8] sm:$0xff]  ;;  %v158_v52 = vld [vmem:[#allocation8 + $0x8] sm:$0xff] }
 0x63f   :  { %v5926_v48 = vadd.f32 %v2035_v41, %v2031_v43  ;;  %v5190_v56 = vpack.c.bf16 %v144_v54, %v143_v1  ;;  %v159_v1 = vld [vmem:[#allocation8 + $0x10] sm:$0xff]  ;;  %v160_v54 = vld [vmem:[#allocation8 + $0x18] sm:$0xff] }
 0x640   :  { %v5928_v49 = vadd.f32 %v2035_v41, %v2030_v45  ;;  %5187 = vmatprep.subr.bf16.mxu0 %v5186_v53  ;;  %v5222_v32 = vpack.c.bf16 %v160_v54, %v159_v1  ;;  %v2270_v1 = vld [vmem:[#allocation2 + $0x1d0] sm:$0xff] }
 0x641   :  { %2040 = vadd.xlane.f32.xlu1 %v5926_v48  ;;  %v2045_v51 = vmul.f32 %v5926_v48, %v5926_v48  ;;  %5189 = vmatpush3.bf16.msra.mxu0 %v5186_v53  ;;  %v5218_v53 = vpack.c.bf16 %v158_v52, %v157_v0  ;;  %v2263_v52 = vld [vmem:[#allocation2 + $0x198] sm:$0xff] }
 0x642   :  { %2038 = vadd.xlane.f32.xlu0 %v5928_v49  ;;  %v2044_v50 = vmul.f32 %v5928_v49, %v5928_v49  ;;  %5191 = vmatprep.subr.bf16.mxu0 %v5190_v56 }
 0x643   :  { %5219 = vmatprep.subr.bf16.mxu1 %v5218_v53 }
 0x644   :  { %5221 = vmatpush3.bf16.msra.mxu1 %v5218_v53  ;;  %v2267_v53 = vld [vmem:[#allocation2 + $0x1b8] sm:$0xff] }
 0x645   :  { %5193 = vmatpush3.bf16.msra.mxu0 %v5190_v56  ;;  %5223 = vmatprep.subr.bf16.mxu1 %v5222_v32  ;;  %v161_v56 = vld [vmem:[#allocation8 + $0x20] sm:$0xff] }
 0x646   :  { %2046 = vadd.xlane.f32.xlu0 %v2044_v50  ;;  %5195 = vmatprep.subr.bf16.mxu0 %v5194_v10  ;;  %v5226_v58 = vpack.c.bf16 %v162_v57, %v161_v56  ;;  %v2262_v56 = vld [vmem:[#allocation2 + $0x190] sm:$0xff]  ;;  %v2265_v57 = vld [vmem:[#allocation2 + $0x1a8] sm:$0xff] }
 0x648   :  { %5225 = vmatpush3.bf16.msra.mxu1 %v5222_v32  ;;  %v5254_v32 = vpack.c.bf16 %v2270_v1, %v2267_v53 }
 0x649   :  { %5197 = vmatpush3.bf16.msra.mxu0 %v5194_v10  ;;  %5227 = vmatprep.subr.bf16.mxu1 %v5226_v58  ;;  %v163_v10 = vld [vmem:[#allocation8 + $0x30] sm:$0xff] }
 0x64a   :  { %2048 = vadd.xlane.f32.xlu0 %v2045_v51  ;;  %5199 = vmatprep.subr.bf16.mxu0 %v5198_v60  ;;  %v5230_v59 = vpack.c.bf16 %v164_v13, %v163_v10  ;;  %v5282_v10 = vpack.c.bf16 %v2265_v57, %v2262_v56  ;;  %v2269_v13 = vld [vmem:[#allocation2 + $0x1c8] sm:$0xff]  ;;  %v2292_v56 = vld [vmem:[#allocation2 + $0x280] sm:$0xff] }
 0x64c   :  { %5229 = vmatpush3.bf16.msra.mxu1 %v5226_v58  ;;  %v2266_v58 = vld [vmem:[#allocation2 + $0x1b0] sm:$0xff] }
 0x64d   :  { %5201 = vmatpush3.bf16.msra.mxu0 %v5198_v60  ;;  %5231 = vmatprep.subr.bf16.mxu1 %v5230_v59  ;;  %v165_v60 = vld [vmem:[#allocation8 + $0x40] sm:$0xff] }
 0x64e   :  { %5203 = vmatprep.subr.bf16.mxu0 %v5202_v63 }
 0x650   :  { %5233 = vmatpush3.bf16.msra.mxu1 %v5230_v59  ;;  %v5256_v59 = vpack.c.bf16 %v2269_v13, %v2266_v58  ;;  %v2295_v58 = vld [vmem:[#allocation2 + $0x298] sm:$0xff] }
 0x651   :  { %5205 = vmatpush3.bf16.msra.mxu0 %v5202_v63  ;;  %v5234_v63 = vpack.c.bf16 %v166_v61, %v165_v60  ;;  %v2299_v13 = vld [vmem:[#allocation2 + $0x2b8] sm:$0xff] }
 0x652   :  { %5207 = vmatprep.subr.bf16.mxu0 %v5206_v5 }
 0x653   :  { %5235 = vmatprep.subr.bf16.mxu1 %v5234_v63 }
 0x654   :  { %5237 = vmatpush3.bf16.msra.mxu1 %v5234_v63 }
 0x655   :  { %5209 = vmatpush3.bf16.msra.mxu0 %v5206_v5  ;;  %v169_v5 = vld [vmem:[#allocation8 + $0x60] sm:$0xff]  ;;  %5239 = vmatprep.subr.bf16.mxu1 %v5238_v3 }
 0x656   :  { %5211 = vmatprep.subr.bf16.mxu0 %v5210_v8  ;;  %v5242_v7 = vpack.c.bf16 %v170_v6, %v169_v5 }
 0x658   :  { %5241 = vmatpush3.bf16.msra.mxu1 %v5238_v3 }
 0x659   :  { %5213 = vmatpush3.bf16.msra.mxu0 %v5210_v8  ;;  %v171_v8 = vld [vmem:[#allocation8 + $0x70] sm:$0xff]  ;;  %5243 = vmatprep.subr.bf16.mxu1 %v5242_v7 }
 0x65a   :  { %5215 = vmatprep.subr.bf16.mxu0 %v5214_v12  ;;  %v5246_v11 = vpack.c.bf16 %v172_v9, %v171_v8  ;;  %v2273_v8 = vld [vmem:[#allocation2 + $0x1e8] sm:$0xff]  ;;  %v2268_v9 = vld [vmem:[#allocation2 + $0x1c0] sm:$0xff] }
 0x65c   :  { %5245 = vmatpush3.bf16.msra.mxu1 %v5242_v7 }
 0x65d   :  { %5217 = vmatpush3.bf16.msra.mxu0 %v5214_v12  ;;  %5247 = vmatprep.subr.bf16.mxu1 %v5246_v11  ;;  %v88_v12 = vld [vmem:[%s6169_s1 + $0x8] sm:$0x3] }
 0x65e   :  { %v2253_v61 = vrot.slane %v88_v12, %v5756_v33 }
 0x660   :  { %5249 = vmatpush3.bf16.msra.mxu1 %v5246_v11  ;;  %v2271_v11 = vld [vmem:[#allocation2 + $0x1d8] sm:$0xff] }
 0x661   :  { %5283 = vmatprep.subr.bf16.mxu1 %v5282_v10 }
 0x6ce   :  { %v2041_v16 = vpop.xlane.xlu1 %2040 }
 0x6cf   :  { %v2039_v14 = vpop.xlane.xlu0 %2038  ;;  %v2043_v19 = vmul.f32 0.03125, %v2041_v16 }
 0x6d0   :  { %v2042_v15 = vmul.f32 0.03125, %v2039_v14  ;;  %v2079_v14 = vrot.slane %v88_v12, %v5748_v31  ;;  %v2272_v12 = vld [vmem:[#allocation2 + $0x1e0] sm:$0xff] }
 0x6d1   :  { %v2053_v24 = vmul.f32 %v2043_v19, %v2043_v19  ;;  %v2057_v41 = vsub.f32 %v5926_v48, %v2043_v19 }
 0x6d2   :  { %v2052_v20 = vmul.f32 %v2042_v15, %v2042_v15  ;;  %v2056_v35 = vsub.f32 %v5928_v49, %v2042_v15 }
 0x6d3   :  { %v2047_v18 = vpop.xlane.xlu0 %2046 }
 0x6d4   :  { %v2050_v21 = vmul.f32 0.03125, %v2047_v18 }
 0x6d6   :  { %v2054_v22 = vsub.f32 %v2050_v21, %v2052_v20 }
 0x6d7   :  { %v2049_v23 = vpop.xlane.xlu0 %2048 }
 0x6d8   :  { %v2058_v25 = vadd.f32 1e-05, %v2054_v22  ;;  %v2051_v26 = vmul.f32 0.03125, %v2049_v23 }
 0x6da   :  { %5441 = vrsqrt.f32 %v2058_v25  ;;  %v2055_v27 = vsub.f32 %v2051_v26, %v2053_v24 }
 0x6dc   :  { %v2059_v28 = vadd.f32 1e-05, %v2055_v27 }
 0x6de   :  { %5443 = vrsqrt.f32 %v2059_v28 }
 0x6e4   :  { %v5442_v37 = vpop.eup %5441 }
 0x6e5   :  { %v2062_v38 = vmul.f32 %v5442_v37, %v2056_v35 }
 0x6e7   :  { %v2068_v42 = vmul.f32 %v2067_v36, %v2062_v38 }
 0x6e8   :  { %v5444_v43 = vpop.eup %5443 }
 0x6e9   :  { %v2074_v44 = vadd.f32 %v2073_v40, %v2068_v42  ;;  %v2063_v45 = vmul.f32 %v5444_v43, %v2057_v41 }
 0x6eb   :  { %4879 = vmatprep.mubr.f32.mxu0 %v2074_v44  ;;  %v2069_v50 = vmul.f32 %v2067_v36, %v2063_v45  ;;  %v2261_v45 = vld [vmem:[#allocation2 + $0x188] sm:$0xff] }
 0x6ed   :  { %v2075_v51 = vadd.f32 %v2073_v40, %v2069_v50  ;;  %v2264_v50 = vld [vmem:[#allocation2 + $0x1a0] sm:$0xff] }
 0x6ee   :  { %v5250_v0 = vpack.c.bf16 %v2264_v50, %v2261_v45  ;;  %v2286_v45 = vld [vmem:[#allocation2 + $0x250] sm:$0xff] }
 0x6ef   :  { %4880 = vmatmul.mubr.f32.vlgmr.msra.gmra.mrb[16].mxu0 %v2075_v51  ;;  %v2260_v51 = vld [vmem:[#allocation2 + $0x180] sm:$0xff] }
 0x6f0   :  { %2449 = vmatprep.mubr.f32.mxu0 %v5619_v55  ;;  %v5252_v54 = vpack.c.bf16 %v2263_v52, %v2260_v51  ;;  %5251 = vmatprep.subr.bf16.mxu0 %v5250_v0  ;;  %v2289_v51 = vld [vmem:[#allocation2 + $0x268] sm:$0xff]  ;;  %v2290_v0 = vld [vmem:[#allocation2 + $0x270] sm:$0xff] }
 0x6f1   :  { %v2293_v52 = vld [vmem:[#allocation2 + $0x288] sm:$0xff]  ;;  %v5298_v53 = vpack.c.bf16 %v2289_v51, %v2286_v45 }
 0x6f2   :  { %5253 = vmatpush1.bf16.msra.mxu0 %v5252_v54  ;;  %v5272_v1 = vpack.c.bf16 %v2293_v52, %v2290_v0  ;;  %v2297_v54 = vld [vmem:[#allocation2 + $0x2a8] sm:$0xff] }
 0x6f3   :  { %5255 = vmatprep.subr.bf16.mxu0 %v5254_v32  ;;  %v2300_v32 = vld [vmem:[#allocation2 + $0x2c0] sm:$0xff] }
 0x6f4   :  { %v5274_v57 = vpack.c.bf16 %v2300_v32, %v2297_v54 }
 0x6f6   :  { %5257 = vmatpush1.bf16.msra.mxu0 %v5256_v59  ;;  %v5302_v59 = vpack.c.bf16 %v2295_v58, %v2292_v56 }
 0x7c2   :  { %v4881_v15 = vpop.f32.mrb[16].mxu0 }
 0x7c3   :  { %v2152_v16 = vadd.f32 %v4881_v15, %v2079_v14  ;;  %v2146_v18 = vpop.f32.mrb[17].mxu0  ;;  %v5286_v15 = vpack.c.bf16 %v2271_v11, %v2268_v9  ;;  %v2307_v11 = vld [vmem:[#allocation2 + $0x2f8] sm:$0xff] }
 0x7c4   :  { %v2147_v19 = vadd.f32 %v2146_v18, %v2079_v14  ;;  %v2275_v14 = vld [vmem:[#allocation2 + $0x1f8] sm:$0xff] }
 0x7c5   :  { %v2156_v20 = vmul.f32 %v2152_v16, %v2152_v16  ;;  %v2279_v18 = vld [vmem:[#allocation2 + $0x218] sm:$0xff] }
 0x7c6   :  { %v2155_v21 = vmul.f32 %v2147_v19, %v2147_v19 }
 0x7c7   :  { %v2158_v22 = vmul.f32 %v2156_v20, %v2152_v16  ;;  %v2274_v20 = vld [vmem:[#allocation2 + $0x1f0] sm:$0xff] }
 0x7c8   :  { %v2157_v23 = vmul.f32 %v2155_v21, %v2147_v19 }
 0x7c9   :  { %v2160_v24 = vmul.f32 0.044715, %v2158_v22  ;;  %v2277_v22 = vld [vmem:[#allocation2 + $0x208] sm:$0xff] }
 0x7ca   :  { %v2159_v25 = vmul.f32 0.044715, %v2157_v23  ;;  %v2278_v23 = vld [vmem:[#allocation2 + $0x210] sm:$0xff] }
 0x7cb   :  { %v2162_v26 = vadd.f32 %v2160_v24, %v2152_v16  ;;  %v2281_v24 = vld [vmem:[#allocation2 + $0x228] sm:$0xff] }
 0x7cc   :  { %v2161_v27 = vadd.f32 %v2159_v25, %v2147_v19  ;;  %v5290_v25 = vpack.c.bf16 %v2277_v22, %v2274_v20 }
 0x7cd   :  { %v2164_v28 = vmul.f32 0.7978846, %v2162_v26  ;;  %v5264_v26 = vpack.c.bf16 %v2281_v24, %v2278_v23 }
 0x7ce   :  { %v2163_v35 = vmul.f32 0.7978846, %v2161_v27  ;;  %v2285_v27 = vld [vmem:[#allocation2 + $0x248] sm:$0xff] }
 0x7cf   :  { %5445 = vtanh.f32 %v2164_v28  ;;  %v2288_v28 = vld [vmem:[#allocation2 + $0x260] sm:$0xff] }
 0x7d0   :  { %5447 = vtanh.f32 %v2163_v35  ;;  %v2280_v35 = vld [vmem:[#allocation2 + $0x220] sm:$0xff] }
 0x7d9   :  { %v5446_v36 = vpop.eup %5445 }
 0x7da   :  { %v5448_v37 = vpop.eup %5447  ;;  %v2168_v38 = vadd.f32 1.0, %v5446_v36  ;;  %v5266_v36 = vpack.c.bf16 %v2288_v28, %v2285_v27 }
 0x7db   :  { %v2167_v40 = vadd.f32 1.0, %v5448_v37  ;;  %v2283_v37 = vld [vmem:[#allocation2 + $0x238] sm:$0xff] }
 0x7dc   :  { %v2170_v41 = vmul.f32 0.5, %v2168_v38  ;;  %v2284_v38 = vld [vmem:[#allocation2 + $0x240] sm:$0xff] }
 0x7dd   :  { %v2169_v42 = vmul.f32 0.5, %v2167_v40  ;;  %v2287_v40 = vld [vmem:[#allocation2 + $0x258] sm:$0xff] }
 0x7de   :  { %v2172_v44 = vmul.f32 %v2170_v41, %v2152_v16  ;;  %v5260_v16 = vpack.c.bf16 %v2275_v14, %v2272_v12  ;;  %v5294_v41 = vpack.c.bf16 %v2283_v37, %v2280_v35  ;;  %v5969_v35 = vld [vmem:[%s6169_s1 + $0x10] sm:$0xff] }
 0x7df   :  { %v2171_v43 = vmul.f32 %v2169_v42, %v2147_v19  ;;  %v2282_v19 = vld [vmem:[#allocation2 + $0x230] sm:$0xff]  ;;  %v5268_v42 = vpack.c.bf16 %v2287_v40, %v2284_v38  ;;  %v2376_v37 = vrot.slane %v5969_v35, %v5748_v31  ;;  %v2540_v52 = vrot.slane %v5969_v35, %v365_v46 }
 0x7e0   :  { %v5262_v21 = vpack.c.bf16 %v2282_v19, %v2279_v18 }
 0x7e1   :  { %4914 = vmatprep.mubr.f32.mxu1 %v2171_v43  ;;  %v2291_v43 = vld [vmem:[#allocation2 + $0x278] sm:$0xff] }
 0x7e2   :  { %4915 = vmatmul.mubr.f32.vlgmr.msra.gmra.mrb[24].mxu1 %v2172_v44  ;;  %v2294_v44 = vld [vmem:[#allocation2 + $0x290] sm:$0xff] }
 0x7e3   :  { %5285 = vmatpush3.bf16.msra.mxu1 %v5282_v10  ;;  %v5270_v50 = vpack.c.bf16 %v2294_v44, %v2291_v43  ;;  %v2296_v10 = vld [vmem:[#allocation2 + $0x2a0] sm:$0xff] }
 0x7e4   :  { %5287 = vmatprep.subr.bf16.mxu1 %v5286_v15 }
 0x7e7   :  { %5289 = vmatpush3.bf16.msra.mxu1 %v5286_v15 }
 0x7e8   :  { %5291 = vmatprep.subr.bf16.mxu1 %v5290_v25 }
 0x7eb   :  { %5293 = vmatpush3.bf16.msra.mxu1 %v5290_v25 }
 0x7ec   :  { %5295 = vmatprep.subr.bf16.mxu1 %v5294_v41 }
 0x7ef   :  { %5297 = vmatpush3.bf16.msra.mxu1 %v5294_v41  ;;  %v2382_v41 = vrot.slane %v5969_v35, %v5756_v33 }
 0x7f0   :  { %5299 = vmatprep.subr.bf16.mxu1 %v5298_v53 }
 0x7f3   :  { %5301 = vmatpush3.bf16.msra.mxu1 %v5298_v53  ;;  %v2560_v53 = vrot.slane %v5969_v35, %v385_v47 }
 0x7f4   :  { %5303 = vmatprep.subr.bf16.mxu1 %v5302_v59 }
 0x7f7   :  { %5305 = vmatpush3.bf16.msra.mxu1 %v5302_v59 }
 0x8b5   :  { %v4916_v60 = vpop.f32.mrb[24].mxu1 }
 0x8b6   :  { %v2239_v62 = vpop.f32.mrb[25].mxu1  ;;  %v2249_v63 = vadd.f32 %v4916_v60, %v5926_v48  ;;  %v2276_v48 = vld [vmem:[#allocation2 + $0x200] sm:$0xff]  ;;  %v5276_v60 = vpack.c.bf16 %v2299_v13, %v2296_v10 }
 0x8b7   :  { %v2248_v2 = vadd.f32 %v2239_v62, %v5928_v49  ;;  %v5258_v49 = vpack.c.bf16 %v2276_v48, %v2273_v8  ;;  %v2306_v62 = vld [vmem:[#allocation2 + $0x2f0] sm:$0xff]  ;;  %v2305_v8 = vld [vmem:[#allocation2 + $0x2e8] sm:$0xff] }
 0x8b8   :  { %v5956_v5 = vadd.f32 %v2253_v61, %v2249_v63  ;;  %v2298_v63 = vld [vmem:[#allocation2 + $0x2b0] sm:$0xff] }
 0x8b9   :  { %v5954_v3 = vadd.f32 %v2253_v61, %v2248_v2  ;;  %5259 = vmatprep.subr.bf16.mxu0 %v5258_v49  ;;  %v2303_v61 = vld [vmem:[#allocation2 + $0x2d8] sm:$0xff]  ;;  %v2304_v49 = vld [vmem:[#allocation2 + $0x2e0] sm:$0xff] }
 0x8ba   :  { %v2354_v7 = vmul.f32 %v5956_v5, %v5956_v5  ;;  %5261 = vmatpush1.bf16.msra.mxu0 %v5260_v16  ;;  %v5278_v2 = vpack.c.bf16 %v2306_v62, %v2303_v61  ;;  %v5310_v12 = vpack.c.bf16 %v2307_v11, %v2304_v49 }
 0x8bb   :  { %2347 = vadd.xlane.f32.xlu0 %v5954_v3  ;;  %v2353_v6 = vmul.f32 %v5954_v3, %v5954_v3  ;;  %5263 = vmatprep.subr.bf16.mxu0 %v5262_v21 }
 0x8bd   :  { %2355 = vadd.xlane.f32.xlu1 %v2353_v6  ;;  %v2301_v6 = vld [vmem:[#allocation2 + $0x2c8] sm:$0xff] }
 0x8be   :  { %5265 = vmatpush1.bf16.msra.mxu0 %v5264_v26  ;;  %v5306_v48 = vpack.c.bf16 %v2301_v6, %v2298_v63  ;;  %v2580_v6 = vrot.slane %v5969_v35, %v405_v4 }
 0x8bf   :  { %2349 = vadd.xlane.f32.xlu0 %v5956_v5  ;;  %5267 = vmatprep.subr.bf16.mxu0 %v5266_v36 }
 0x8c0   :  { %5307 = vmatprep.subr.bf16.mxu1 %v5306_v48 }
 0x8c1   :  { %2357 = vadd.xlane.f32.xlu1 %v2354_v7  ;;  %v2302_v7 = vld [vmem:[#allocation2 + $0x2d0] sm:$0xff]  ;;  %5309 = vmatpush3.bf16.msra.mxu1 %v5306_v48 }
 0x8c2   :  { %5269 = vmatpush1.bf16.msra.mxu0 %v5268_v42  ;;  %v5280_v9 = vpack.c.bf16 %v2305_v8, %v2302_v7  ;;  %5311 = vmatprep.subr.bf16.mxu1 %v5310_v12 }
 0x8c3   :  { %5271 = vmatprep.subr.bf16.mxu0 %v5270_v50 }
 0x8c5   :  { %5313 = vmatpush3.bf16.msra.mxu1 %v5310_v12 }
 0x8c6   :  { %5273 = vmatpush1.bf16.msra.mxu0 %v5272_v1  ;;  %4967 = vmatprep.subr.mxu1 %v5619_v55 }
 0x8c7   :  { %5275 = vmatprep.subr.bf16.mxu0 %v5274_v57 }
 0x8ca   :  { %5277 = vmatpush1.bf16.msra.mxu0 %v5276_v60 }
 0x8cb   :  { %5279 = vmatprep.subr.bf16.mxu0 %v5278_v2 }
 0x8ce   :  { %5281 = vmatpush1.bf16.msra.mxu0 %v5280_v9 }
 0x8cf   :  { %4952 = vmatprep.subr.mxu0 %v5619_v55 }
 0x948   :  { %v2348_v14 = vpop.xlane.xlu0 %2347 }
 0x949   :  { %v2351_v15 = vmul.f32 0.03125, %v2348_v14 }
 0x94a   :  { %v2356_v16 = vpop.xlane.xlu1 %2355 }
 0x94b   :  { %v2361_v18 = vmul.f32 %v2351_v15, %v2351_v15  ;;  %v2359_v19 = vmul.f32 0.03125, %v2356_v16  ;;  %v2365_v36 = vsub.f32 %v5954_v3, %v2351_v15 }
 0x94c   :  { %v2350_v20 = vpop.xlane.xlu0 %2349 }
 0x94d   :  { %v2363_v21 = vsub.f32 %v2359_v19, %v2361_v18  ;;  %v2352_v22 = vmul.f32 0.03125, %v2350_v20 }
 0x94e   :  { %v2358_v23 = vpop.xlane.xlu1 %2357 }
 0x94f   :  { %v2367_v24 = vadd.f32 1e-05, %v2363_v21  ;;  %v2362_v25 = vmul.f32 %v2352_v22, %v2352_v22  ;;  %v2360_v26 = vmul.f32 0.03125, %v2358_v23  ;;  %v2366_v42 = vsub.f32 %v5956_v5, %v2352_v22 }
 0x951   :  { %5449 = vrsqrt.f32 %v2367_v24  ;;  %v2364_v27 = vsub.f32 %v2360_v26, %v2362_v25 }
 0x953   :  { %v2368_v28 = vadd.f32 1e-05, %v2364_v27 }
 0x955   :  { %5451 = vrsqrt.f32 %v2368_v28 }
 0x95b   :  { %v5450_v38 = vpop.eup %5449 }
 0x95c   :  { %v2371_v40 = vmul.f32 %v5450_v38, %v2365_v36 }
 0x95e   :  { %v2377_v43 = vmul.f32 %v2376_v37, %v2371_v40 }
 0x95f   :  { %v5452_v44 = vpop.eup %5451 }
 0x960   :  { %v2383_v45 = vadd.f32 %v2382_v41, %v2377_v43  ;;  %v2372_v50 = vmul.f32 %v5452_v44, %v2366_v42 }
 0x962   :  { %2450 = vmatmul.mubr.f32.vlgmr.msra.gmra.mrb[18].mxu0 %v2383_v45  ;;  %4949 = vmatprep.mubr.f32.mxu1 %v2383_v45  ;;  %v2378_v51 = vmul.f32 %v2376_v37, %v2372_v50 }
 0x963   :  { %2455 = vmatprep.mubr.f32.mxu0 %v5619_v55 }
 0x964   :  { %v2384_v0 = vadd.f32 %v2382_v41, %v2378_v51 }
 0x966   :  { %2456 = vmatmul.mubr.f32.gmra.mrb[20].mxu0 %v2384_v0  ;;  %4950 = vmatmul.mubr.f32.vlgmr.msra.gmra.mrb[26].mxu1 %v2384_v0 }
 0x967   :  { %4954 = vmatprep.mubr.msk.f32.mxu0 %vm5620_vm0, %v5619_v55  ;;  %4969 = vmatprep.mubr.msk.f32.mxu1 %vm5620_vm0, %v5619_v55 }
 0xa35   :  { %v2451_v1 = vpop.f32.mrb[18].mxu0 }
 0xa36   :  { %v2541_v54 = vadd.f32 %v2540_v52, %v2451_v1  ;;  %v2453_v32 = vpop.f32.mrb[19].mxu0 }
 0xa37   :  { %v2561_v56 = vadd.f32 %v2560_v53, %v2453_v32 }
 0xa38   :  { %2545 = vrot.lane.b32.xlu1 %v2541_v54, %s5621_s27 }
 0xa39   :  { %2565 = vrot.lane.b32.xlu0 %v2561_v56, %s5621_s27  ;;  %v2457_v57 = vpop.f32.mrb[20].mxu0  ;;  %v4951_v58 = vpop.f32.mrb[26].mxu1  ;;  %4953 = vmatpush3.xpose.msk.msra.mxu0 %vm429_vm1, %v2561_v56 }
 0xa3a   :  { %v2459_v10 = vpop.f32.mrb[21].mxu0  ;;  %v2528_v13 = vpop.f32.mrb[27].mxu1  ;;  %4957 = vmatprep.subr.mxu0 %v5619_v55  ;;  %v2542_v47 = vadd.f32 %v2540_v52, %v2457_v57  ;;  %v6044_v11 = vadd.f32 %v4951_v58, %v2580_v6 }
 0xa3b   :  { %v2562_v46 = vadd.f32 %v2560_v53, %v2459_v10  ;;  %v6032_v48 = vadd.f32 %v2580_v6, %v2528_v13 }
 0xa3c   :  { %4955 = vmatmul.mubr.msk.f32.vlgmr.msra.gmra.mrb[22].mxu0 %vm429_vm1, %v2541_v54 }
 0xa3d   :  { %2569 = vrot.lane.b32.xlu0 %v2561_v56, %s5622_s28  ;;  %2567 = vrot.lane.b32.xlu1 %v2562_v46, %s5621_s27 }
 0xa3e   :  { %4958 = vmatpush3.xpose.msk.msra.mxu0 %vm429_vm1, %v2562_v46  ;;  %4959 = vmatprep.mubr.msk.f32.mxu0 %vm5620_vm0, %v5619_v55 }
 0xa3f   :  { %4962 = vmatprep.subr.mxu0 %v5619_v55 }
 0xa41   :  { %4960 = vmatmul.mubr.msk.f32.vlgmr.msra.gmra.mrb[24].mxu0 %vm429_vm1, %v2542_v47  ;;  %2549 = vrot.lane.b32.xlu0 %v2541_v54, %s5622_s28 }
 0xa42   :  { %2547 = vrot.lane.b32.xlu1 %v2542_v47, %s5621_s27  ;;  %4964 = vmatprep.mubr.msk.f32.mxu0 %vm5620_vm0, %v5619_v55 }
 0xa45   :  { %2573 = vrot.lane.b32.xlu0 %v2561_v56, %s5623_s29 }
 0xa46   :  { %2571 = vrot.lane.b32.xlu1 %v2562_v46, %s5622_s28 }
 0xa49   :  { %2553 = vrot.lane.b32.xlu0 %v2541_v54, %s5623_s29 }
 0xa4a   :  { %2551 = vrot.lane.b32.xlu1 %v2542_v47, %s5622_s28 }
 0xa4e   :  { %2575 = vrot.lane.b32.xlu1 %v2562_v46, %s5623_s29 }
 0xa52   :  { %2555 = vrot.lane.b32.xlu1 %v2542_v47, %s5623_s29 }
 0xaaa   :  { %v2546_v59 = vpop.permute.xlu1 %2545 }
 0xaab   :  { %v2566_v60 = vpop.permute.xlu0 %2565 }
 0xaac   :  { %4963 = vmatpush3.xpose.msk.msra.mxu0 %vm429_vm1, %v2566_v60 }
 0xaad   :  { %4972 = vmatprep.subr.mxu0 %v5619_v55 }
 0xaaf   :  { %v2570_v61 = vpop.permute.xlu0 %2569  ;;  %4965 = vmatmul.mubr.msk.f32.vlgmr.msra.gmra.mrb[26].mxu0 %vm429_vm1, %v2546_v59  ;;  %v2568_v62 = vpop.permute.xlu1 %2567 }
 0xab0   :  { %4968 = vmatpush3.xpose.msk.msra.mxu1 %vm429_vm1, %v2568_v62  ;;  %4973 = vmatpush3.xpose.msk.msra.mxu0 %vm429_vm1, %v2570_v61 }
 0xab1   :  { %4974 = vmatprep.mubr.msk.f32.mxu0 %vm5620_vm0, %v5619_v55  ;;  %4977 = vmatprep.subr.mxu1 %v5619_v55 }
 0xab2   :  { %4982 = vmatprep.subr.mxu0 %v5619_v55 }
 0xab3   :  { %v2550_v63 = vpop.permute.xlu0 %2549 }
 0xab4   :  { %v2548_v2 = vpop.permute.xlu1 %2547  ;;  %4975 = vmatmul.mubr.msk.f32.vlgmr.msra.gmra.mrb[28].mxu0 %vm429_vm1, %v2550_v63 }
 0xab5   :  { %4970 = vmatmul.mubr.msk.f32.vlgmr.msra.gmra.mrb[28].mxu1 %vm429_vm1, %v2548_v2  ;;  %4984 = vmatprep.mubr.msk.f32.mxu0 %vm5620_vm0, %v5619_v55 }
 0xab6   :  { %4979 = vmatprep.mubr.msk.f32.mxu1 %vm5620_vm0, %v5619_v55 }
 0xab7   :  { %v2574_v7 = vpop.permute.xlu0 %2573 }
 0xab8   :  { %v2572_v8 = vpop.permute.xlu1 %2571  ;;  %4983 = vmatpush3.xpose.msk.msra.mxu0 %vm429_vm1, %v2574_v7 }
 0xab9   :  { %4978 = vmatpush3.xpose.msk.msra.mxu1 %vm429_vm1, %v2572_v8  ;;  %4992 = vmatprep.subr.mxu0 %v5619_v55 }
 0xaba   :  { %4987 = vmatprep.subr.mxu1 %v5619_v55 }
 0xabb   :  { %v2554_v9 = vpop.permute.xlu0 %2553 }
 0xabc   :  { %v2552_v49 = vpop.permute.xlu1 %2551  ;;  %4985 = vmatmul.mubr.msk.f32.vlgmr.msra.gmra.mrb[30].mxu0 %vm429_vm1, %v2554_v9 }
 0xabd   :  { %4980 = vmatmul.mubr.msk.f32.vlgmr.msra.gmra.mrb[30].mxu1 %vm429_vm1, %v2552_v49  ;;  %4993 = vmatpush3.msra.mxu0 %v6032_v48 }
 0xabe   :  { %4989 = vmatprep.mubr.msk.f32.mxu1 %vm5620_vm0, %v5619_v55  ;;  %4994 = vmatprep.mubr.msk.f32.mxu0 %vm5620_vm0, %v5619_v55 }
 0xabf   :  { %5002 = vmatprep.subr.mxu0 %v5619_v55 }
 0xac0   :  { %v2576_v4 = vpop.permute.xlu1 %2575 }
 0xac1   :  { %4988 = vmatpush3.xpose.msk.msra.mxu1 %vm429_vm1, %v2576_v4 }
 0xac2   :  { %4997 = vmatprep.subr.mxu1 %v5619_v55 }
 0xac4   :  { %v2556_v12 = vpop.permute.xlu1 %2555 }
 0xac5   :  { %4990 = vmatmul.mubr.msk.f32.vlgmr.msra.gmra.mrb[32].mxu1 %vm429_vm1, %v2556_v12 }
 0xac6   :  { %4998 = vmatpush3.msra.mxu1 %v6044_v11  ;;  %4999 = vmatprep.mubr.msk.f32.mxu1 %vm5620_vm0, %v5619_v55 }
 0xac7   :  { %5007 = vmatprep.subr.mxu1 %v5619_v55 }
 0xb0f   :  { %v2673_v14 = vpop.f32.mrb[22].mxu0 }
 0xb10   :  { %v2674_v15 = vadd.f32 %v2673_v14, %v5846_v17  ;;  %v4956_v16 = vpop.f32.mrb[23].mxu0 }
 0xb12   :  { %v3195_v18 = vsel %vm429_vm1, %v2674_v15, -inf }
 0xb13   :  { %3196 = vmax.xlane.f32.xlu0 %v3195_v18 }
 0xb14   :  { %v2747_v19 = vpop.f32.mrb[24].mxu0 }
 0xb15   :  { %v2748_v20 = vadd.f32 %v2747_v19, %v5846_v17  ;;  %v4961_v21 = vpop.f32.mrb[25].mxu0 }
 0xb17   :  { %v3198_v22 = vsel %vm429_vm1, %v2748_v20, -inf }
 0xb18   :  { %3199 = vmax.xlane.f32.xlu1 %v3198_v22 }
 0xb82   :  { %v2821_v23 = vpop.f32.mrb[26].mxu0 }
 0xb83   :  { %v2822_v24 = vadd.f32 %v2821_v23, %v5846_v17  ;;  %v4966_v25 = vpop.f32.mrb[27].mxu0 }
 0xb85   :  { %v3201_v26 = vsel %vm429_vm1, %v2822_v24, -inf }
 0xb86   :  { %3202 = vmax.xlane.f32.xlu0 %v3201_v26 }
 0xb87   :  { %v2969_v27 = vpop.f32.mrb[28].mxu0 }
 0xb88   :  { %v2895_v28 = vpop.f32.mrb[28].mxu1  ;;  %v4976_v36 = vpop.f32.mrb[29].mxu0  ;;  %v2970_v40 = vadd.f32 %v2969_v27, %v5846_v17 }
 0xb89   :  { %v2896_v37 = vadd.f32 %v2895_v28, %v5846_v17  ;;  %v4971_v38 = vpop.f32.mrb[29].mxu1 }
 0xb8a   :  { %v3207_v43 = vsel %vm429_vm1, %v2970_v40, -inf }
 0xb8b   :  { %v3204_v41 = vsel %vm429_vm1, %v2896_v37, -inf }
 0xb8c   :  { %3205 = vmax.xlane.f32.xlu0 %v3204_v41 }
 0xb8f   :  { %v3117_v42 = vpop.f32.mrb[30].mxu0 }
 0xb90   :  { %v3118_v44 = vadd.f32 %v3117_v42, %v5846_v17  ;;  %3208 = vmax.xlane.f32.xlu0 %v3207_v43  ;;  %v3043_v45 = vpop.f32.mrb[30].mxu1  ;;  %v4986_v50 = vpop.f32.mrb[31].mxu0 }
 0xb91   :  { %v3044_v51 = vadd.f32 %v3043_v45, %v5846_v17  ;;  %v4981_v0 = vpop.f32.mrb[31].mxu1 }
 0xb92   :  { %v3213_v52 = vsel %vm429_vm1, %v3118_v44, -inf }
 0xb93   :  { %v3210_v53 = vsel %vm429_vm1, %v3044_v51, -inf }
 0xb94   :  { %3214 = vmax.xlane.f32.xlu0 %v3213_v52  ;;  %3211 = vmax.xlane.f32.xlu1 %v3210_v53 }
 0xb98   :  { %v3191_v1 = vpop.f32.mrb[32].mxu1 }
 0xb99   :  { %v3192_v54 = vadd.f32 %v3191_v1, %v5846_v17  ;;  %v4991_v32 = vpop.f32.mrb[33].mxu1 }
 0xb9b   :  { %v3216_v56 = vsel %vm429_vm1, %v3192_v54, -inf }
 0xb9c   :  { %3217 = vmax.xlane.f32.xlu1 %v3216_v56 }
 0xba0   :  { %v3197_v57 = vpop.xlane.xlu0 %3196 }
 0xba1   :  { %v3219_v58 = vsub.f32 %v2674_v15, %v3197_v57 }
 0xba3   :  { %v3227_v10 = vmul.f32 1.442695, %v3219_v58 }
 0xba5   :  { %5453 = vpow2.f32 %v3227_v10  ;;  %v3200_v13 = vpop.xlane.xlu1 %3199 }
 0xba6   :  { %v3220_v46 = vsub.f32 %v2748_v20, %v3200_v13 }
 0xba8   :  { %v3229_v47 = vmul.f32 1.442695, %v3220_v46 }
 0xbaa   :  { %5455 = vpow2.f32 %v3229_v47 }
 0xbaf   :  { %v5454_v59 = vpop.eup %5453 }
 0xbb0   :  { %v3243_v60 = vsel %vm429_vm1, %v5454_v59, 0.0 }
 0xbb1   :  { %3244 = vadd.xlane.f32.xlu0 %v3243_v60 }
 0xbb4   :  { %v5456_v61 = vpop.eup %5455 }
 0xbb5   :  { %v3246_v62 = vsel %vm429_vm1, %v5456_v61, 0.0 }
 0xbb6   :  { %3247 = vadd.xlane.f32.xlu1 %v3246_v62 }
 0xbc7   :  { %2587 = vrot.lane.b32.xlu1 %v6044_v11, %s5621_s27 }
 0xbcb   :  { %2591 = vrot.lane.b32.xlu1 %v6032_v48, %s5622_s28 }
 0xc13   :  { %v3203_v17 = vpop.xlane.xlu0 %3202 }
 0xc14   :  { %v3221_v63 = vsub.f32 %v2822_v24, %v3203_v17 }
 0xc16   :  { %v3231_v2 = vmul.f32 1.442695, %v3221_v63 }
 0xc18   :  { %5457 = vpow2.f32 %v3231_v2 }
 0xc19   :  { %v3206_v6 = vpop.xlane.xlu0 %3205 }
 0xc1a   :  { %v3222_v7 = vsub.f32 %v2896_v37, %v3206_v6 }
 0xc1c   :  { %v3233_v8 = vmul.f32 1.442695, %v3222_v7 }
 0xc1d   :  { %v3209_v14 = vpop.xlane.xlu0 %3208 }
 0xc1e   :  { %5459 = vpow2.f32 %v3233_v8  ;;  %v3223_v20 = vsub.f32 %v2970_v40, %v3209_v14 }
 0xc20   :  { %v3235_v22 = vmul.f32 1.442695, %v3223_v20  ;;  %v2311_v20 = vld [vmem:[#allocation5 + $0x30] sm:$0xff] }
 0xc21   :  { %v3215_v15 = vpop.xlane.xlu0 %3214  ;;  %v3212_v16 = vpop.xlane.xlu1 %3211 }
 0xc22   :  { %v5458_v9 = vpop.eup %5457  ;;  %v3225_v23 = vsub.f32 %v3118_v44, %v3215_v15  ;;  %v3224_v25 = vsub.f32 %v3044_v51, %v3212_v16 }
 0xc23   :  { %v3249_v49 = vsel %vm429_vm1, %v5458_v9, 0.0 }
 0xc24   :  { %3250 = vadd.xlane.f32.xlu0 %v3249_v49  ;;  %v3239_v27 = vmul.f32 1.442695, %v3225_v23  ;;  %v3237_v28 = vmul.f32 1.442695, %v3224_v25  ;;  %v2309_v49 = vld [vmem:[#allocation5 + $0x20] sm:$0xff] }
 0xc28   :  { %v6074_v4 = vpop.eup %5459 }
 0xc29   :  { %v3252_v12 = vsel %vm429_vm1, %v6074_v4, 0.0  ;;  %v3218_v19 = vpop.xlane.xlu1 %3217 }
 0xc2a   :  { %3253 = vadd.xlane.f32.xlu1 %v3252_v12  ;;  %v3226_v36 = vsub.f32 %v3192_v54, %v3218_v19 }
 0xc2c   :  { %v3241_v40 = vmul.f32 1.442695, %v3226_v36 }
 0xc3a   :  { %2585 = vrot.lane.b32.xlu0 %v6032_v48, %s5621_s27 }
 0xc3b   :  { %2593 = vrot.lane.b32.xlu1 %v6044_v11, %s5622_s28 }
 0xc3e   :  { %v3245_v18 = vpop.xlane.xlu0 %3244 }
 0xc3f   :  { %5461 = vrcp.f32 %v3245_v18 }
 0xc43   :  { %v3248_v21 = vpop.xlane.xlu1 %3247 }
 0xc44   :  { %5463 = vrcp.f32 %v3248_v21 }
 0xc45   :  { %5465 = vpow2.f32 %v3235_v22 }
 0xc46   :  { %5467 = vpow2.f32 %v3239_v27 }
 0xc47   :  { %5469 = vpow2.f32 %v3237_v28  ;;  %v2588_v41 = vpop.permute.xlu1 %2587 }
 0xc48   :  { %5471 = vpow2.f32 %v3241_v40 }
 0xc49   :  { %v5462_v24 = vpop.eup %5461 }
 0xc4a   :  { %v3283_v26 = vmul.f32 %v5462_v24, %v5454_v59 }
 0xc4b   :  { %v2592_v1 = vpop.permute.xlu1 %2591 }
 0xc4c   :  { %4995 = vmatmul.mubr.msk.f32.vlgmr.msra.gmra.mrb[32].mxu0 %vm429_vm1, %v3283_v26 }
 0xc4d   :  { %5004 = vmatprep.mubr.msk.f32.mxu0 %vm5620_vm0, %v5619_v55 }
 0xc4e   :  { %v5464_v37 = vpop.eup %5463 }
 0xc4f   :  { %v3284_v38 = vmul.f32 %v5464_v37, %v5456_v61  ;;  %v5466_v42 = vpop.eup %5465  ;;  %v4208_v37 = vrot.slane %v5969_v35, %v2034_v39 }
 0xc50   :  { %v3255_v43 = vsel %vm429_vm1, %v5466_v42, 0.0  ;;  %v5468_v44 = vpop.eup %5467 }
 0xc51   :  { %5000 = vmatmul.mubr.msk.f32.vlgmr.msra.gmra.mrb[34].mxu1 %vm429_vm1, %v3284_v38  ;;  %v5470_v45 = vpop.eup %5469  ;;  %v3261_v50 = vsel %vm429_vm1, %v5468_v44, 0.0 }
 0xc52   :  { %5008 = vmatpush3.msra.mxu1 %v2588_v41  ;;  %5009 = vmatprep.mubr.msk.f32.mxu1 %vm5620_vm0, %v5619_v55  ;;  %v3258_v51 = vsel %vm429_vm1, %v5470_v45, 0.0  ;;  %v5472_v0 = vpop.eup %5471 }
 0xc53   :  { %5017 = vmatprep.subr.mxu1 %v5619_v55  ;;  %v3264_v52 = vsel %vm429_vm1, %v5472_v0, 0.0 }
 0xc59   :  { %3256 = vadd.xlane.f32.xlu0 %v3255_v43 }
 0xc5d   :  { %3262 = vadd.xlane.f32.xlu0 %v3261_v50  ;;  %v2315_v50 = vld [vmem:[#allocation7 + $0x88] sm:$0xff] }
 0xc5f   :  { %3259 = vadd.xlane.f32.xlu1 %v3258_v51 }
 0xc63   :  { %3265 = vadd.xlane.f32.xlu1 %v3264_v52 }
 0xc73   :  { %2597 = vrot.lane.b32.xlu0 %v6032_v48, %s5623_s29 }
 0xc74   :  { %2599 = vrot.lane.b32.xlu1 %v6044_v11, %s5623_s29 }
 0xcb1   :  { %v3251_v53 = vpop.xlane.xlu0 %3250 }
 0xcb2   :  { %5473 = vrcp.f32 %v3251_v53  ;;  %v2318_v53 = vld [vmem:[#allocation7 + $0xa0] sm:$0xff] }
 0xcb5   :  { %v2586_v54 = vpop.permute.xlu0 %2585 }
 0xcb6   :  { %5003 = vmatpush3.msra.mxu0 %v2586_v54 }
 0xcb7   :  { %v3254_v32 = vpop.xlane.xlu1 %3253  ;;  %5012 = vmatprep.subr.mxu0 %v5619_v55 }
 0xcb8   :  { %5475 = vrcp.f32 %v3254_v32  ;;  %v2320_v32 = vld [vmem:[#allocation7 + $0xb0] sm:$0xff] }
 0xcbb   :  { %v2594_v58 = vpop.permute.xlu1 %2593 }
 0xcbc   :  { %v5474_v56 = vpop.eup %5473 }
 0xcbd   :  { %v3285_v57 = vmul.f32 %v5474_v56, %v5458_v9  ;;  %v2310_v9 = vld [vmem:[#allocation5 + $0x28] sm:$0xff]  ;;  %v2321_v56 = vld [vmem:[#allocation7 + $0xb8] sm:$0xff] }
 0xcbf   :  { %5005 = vmatmul.mubr.msk.f32.vlgmr.msra.gmra.mrb[34].mxu0 %vm429_vm1, %v3285_v57  ;;  %v5326_v57 = vpack.c.bf16 %v2321_v56, %v2320_v32  ;;  %v2344_v32 = vld [vmem:[#allocation8 + $0xe8] sm:$0xff] }
 0xcc0   :  { %5013 = vmatpush3.msra.mxu0 %v2592_v1  ;;  %5014 = vmatprep.mubr.msk.f32.mxu0 %vm5620_vm0, %v5619_v55  ;;  %v2319_v1 = vld [vmem:[#allocation7 + $0xa8] sm:$0xff] }
 0xcc1   :  { %5022 = vmatprep.subr.mxu0 %v5619_v55  ;;  %v5322_v54 = vpack.c.bf16 %v2319_v1, %v2318_v53  ;;  %v2342_v53 = vld [vmem:[#allocation8 + $0xd8] sm:$0xff] }
 0xcc2   :  { %v5476_v48 = vpop.eup %5475 }
 0xcc3   :  { %v3286_v11 = vmul.f32 %v5476_v48, %v6074_v4  ;;  %v2322_v48 = vld [vmem:[#allocation7 + $0xc0] sm:$0xff] }
 0xcc5   :  { %5010 = vmatmul.mubr.msk.f32.vlgmr.msra.gmra.mrb[36].mxu1 %vm429_vm1, %v3286_v11  ;;  %v2323_v11 = vld [vmem:[#allocation7 + $0xc8] sm:$0xff] }
 0xcc6   :  { %5018 = vmatpush3.msra.mxu1 %v2594_v58  ;;  %5019 = vmatprep.mubr.msk.f32.mxu1 %vm5620_vm0, %v5619_v55  ;;  %v5330_v58 = vpack.c.bf16 %v2323_v11, %v2322_v48  ;;  %v2346_v48 = vld [vmem:[#allocation8 + $0xf8] sm:$0xff] }
 0xcc7   :  { %5027 = vmatprep.subr.mxu1 %v5619_v55 }
 0xce6   :  { %v3257_v10 = vpop.xlane.xlu0 %3256 }
 0xce7   :  { %5477 = vrcp.f32 %v3257_v10  ;;  %v2324_v10 = vld [vmem:[#allocation7 + $0xd0] sm:$0xff] }
 0xcea   :  { %v3263_v13 = vpop.xlane.xlu0 %3262 }
 0xceb   :  { %5479 = vrcp.f32 %v3263_v13  ;;  %v2325_v13 = vld [vmem:[#allocation7 + $0xd8] sm:$0xff] }
 0xcec   :  { %v3260_v46 = vpop.xlane.xlu1 %3259 }
 0xced   :  { %5481 = vrcp.f32 %v3260_v46  ;;  %v5334_v46 = vpack.c.bf16 %v2325_v13, %v2324_v10 }
 0xcee   :  { %v2598_v61 = vpop.permute.xlu0 %2597 }
 0xcf0   :  { %v3266_v47 = vpop.xlane.xlu1 %3265 }
 0xcf1   :  { %v5478_v59 = vpop.eup %5477  ;;  %5483 = vrcp.f32 %v3266_v47  ;;  %v2326_v47 = vld [vmem:[#allocation7 + $0xe0] sm:$0xff] }
 0xcf2   :  { %v3287_v60 = vmul.f32 %v5478_v59, %v5466_v42  ;;  %v2327_v59 = vld [vmem:[#allocation7 + $0xe8] sm:$0xff] }
 0xcf4   :  { %5015 = vmatmul.mubr.msk.f32.vlgmr.msra.gmra.mrb[36].mxu0 %vm429_vm1, %v3287_v60  ;;  %v2600_v6 = vpop.permute.xlu1 %2599  ;;  %v5338_v60 = vpack.c.bf16 %v2327_v59, %v2326_v47 }
 0xcf5   :  { %v5480_v62 = vpop.eup %5479  ;;  %5023 = vmatpush3.msra.mxu0 %v2598_v61  ;;  %5024 = vmatprep.mubr.msk.f32.mxu0 %vm5620_vm0, %v5619_v55  ;;  %v2328_v61 = vld [vmem:[#allocation7 + $0xf0] sm:$0xff] }
 0xcf6   :  { %v3289_v17 = vmul.f32 %v5480_v62, %v5468_v44  ;;  %5032 = vmatprep.subr.mxu0 %v2310_v9  ;;  %v2329_v62 = vld [vmem:[#allocation7 + $0xf8] sm:$0xff] }
 0xcf7   :  { %v5482_v63 = vpop.eup %5481 }
 0xcf8   :  { %v3288_v2 = vmul.f32 %v5482_v63, %v5470_v45  ;;  %5025 = vmatmul.mubr.msk.f32.vlgmr.msra.gmra.mrb[38].mxu0 %vm429_vm1, %v3289_v17  ;;  %v5342_v17 = vpack.c.bf16 %v2329_v62, %v2328_v61 }
 0xcf9   :  { %5033 = vmatpush3.msra.mxu0 %v2310_v9 }
 0xcfa   :  { %5020 = vmatmul.mubr.msk.f32.vlgmr.msra.gmra.mrb[38].mxu1 %vm429_vm1, %v3288_v2  ;;  %5037 = vmatprep.subr.mxu0 %v2309_v49 }
 0xcfb   :  { %v5484_v7 = vpop.eup %5483  ;;  %5028 = vmatpush3.msra.mxu1 %v2600_v6  ;;  %5029 = vmatprep.mubr.msk.f32.mxu1 %vm5620_vm0, %v5619_v55  ;;  %v2312_v55 = vld [vmem:[#allocation5 + $0x38] sm:$0xff] }
 0xcfc   :  { %v3290_v8 = vmul.f32 %v5484_v7, %v5472_v0  ;;  %v2317_v0 = vld [vmem:[#allocation7 + $0x98] sm:$0xff] }
 0xcfe   :  { %5030 = vmatmul.mubr.msk.f32.vlgmr.msra.gmra.mrb[40].mxu1 %vm429_vm1, %v3290_v8 }
 0xd1f   :  { %v3360_v4 = vpop.f32.mrb[32].mxu0 }
 0xd20   :  { %v4996_v12 = vpop.f32.mrb[33].mxu0 }
 0xd24   :  { %v3433_v14 = vpop.f32.mrb[34].mxu1 }
 0xd25   :  { %v5001_v15 = vpop.f32.mrb[35].mxu1 }
 0xd92   :  { %v3506_v16 = vpop.f32.mrb[34].mxu0 }
 0xd93   :  { %v5006_v18 = vpop.f32.mrb[35].mxu0  ;;  %5034 = vmatprep.mubr.msk.f32.mxu0 %vm429_vm1, %v3506_v16 }
 0xd98   :  { %v3579_v19 = vpop.f32.mrb[36].mxu1 }
 0xd99   :  { %v5011_v21 = vpop.f32.mrb[37].mxu1  ;;  %5035 = vmatmul.mubr.msk.f32.vlgmr.msra.gmra.mrb[40].mxu0 %vm429_vm1, %v3579_v19 }
 0xd9a   :  { %5039 = vmatprep.mubr.msk.f32.mxu0 %vm429_vm1, %v3360_v4  ;;  %5038 = vmatpush3.msra.mxu0 %v2309_v49  ;;  %v4240_v21 = vrot.slane %v5969_v35, %v2066_v29  ;;  %v2333_v29 = vld [vmem:[#allocation8 + $0x90] sm:$0xff] }
 0xd9b   :  { %5042 = vmatprep.subr.mxu0 %v2311_v20 }
 0xda1   :  { %5040 = vmatmul.mubr.msk.f32.vlgmr.msra.gmra.mrb[40].mxu0 %vm429_vm1, %v3433_v14 }
 0xda2   :  { %5043 = vmatpush3.msra.mxu0 %v2311_v20 }
 0xda3   :  { %5047 = vmatprep.subr.mxu0 %v2312_v55 }
 0xdc7   :  { %v3652_v22 = vpop.f32.mrb[36].mxu0 }
 0xdc8   :  { %v5016_v23 = vpop.f32.mrb[37].mxu0  ;;  %5044 = vmatprep.mubr.msk.f32.mxu0 %vm429_vm1, %v3652_v22 }
 0xdc9   :  { %v4246_v23 = vrot.slane %v5969_v35, %v2072_v34  ;;  %v2335_v34 = vld [vmem:[#allocation8 + $0xa0] sm:$0xff]  ;;  %v2336_v35 = vld [vmem:[#allocation8 + $0xa8] sm:$0xff] }
 0xdcb   :  { %v3798_v24 = vpop.f32.mrb[38].mxu0 }
 0xdcc   :  { %v5026_v25 = vpop.f32.mrb[39].mxu0 }
 0xdcd   :  { %v3725_v26 = vpop.f32.mrb[38].mxu1 }
 0xdce   :  { %v5021_v27 = vpop.f32.mrb[39].mxu1  ;;  %5045 = vmatmul.mubr.msk.f32.vlgmr.msra.gmra.mrb[40].mxu0 %vm429_vm1, %v3725_v26 }
 0xdcf   :  { %5048 = vmatpush3.msra.mxu0 %v2312_v55  ;;  %5049 = vmatprep.mubr.msk.f32.mxu0 %vm429_vm1, %v3798_v24 }
 0xdd1   :  { %v3871_v28 = vpop.f32.mrb[40].mxu1 }
 0xdd2   :  { %v5031_v36 = vpop.f32.mrb[41].mxu1 }
 0xdd6   :  { %5050 = vmatmul.mubr.msk.f32.vlgmr.msra.gmra.mrb[40].mxu0 %vm429_vm1, %v3871_v28 }
 0xea9   :  { %v5051_v38 = vpop.f32.mrb[40].mxu0 }
 0xeaa   :  { %v4204_v40 = vadd.f32 %v5051_v38, %v5956_v5  ;;  %v4192_v41 = vpop.f32.mrb[41].mxu0  ;;  %v2314_v5 = vld [vmem:[#allocation7 + $0x80] sm:$0xff] }
 0xeab   :  { %v4203_v42 = vadd.f32 %v4192_v41, %v5954_v3  ;;  %v5314_v51 = vpack.c.bf16 %v2315_v50, %v2314_v5  ;;  %v2316_v3 = vld [vmem:[#allocation7 + $0x90] sm:$0xff]  ;;  %v2331_v38 = vld [vmem:[#allocation8 + $0x80] sm:$0xff]  ;;  %v2338_v5 = vld [vmem:[#allocation8 + $0xb8] sm:$0xff] }
 0xeac   :  { %v6128_v43 = vadd.f32 %v4208_v37, %v4204_v40  ;;  %v5318_v52 = vpack.c.bf16 %v2317_v0, %v2316_v3  ;;  %v2332_v40 = vld [vmem:[#allocation8 + $0x88] sm:$0xff]  ;;  %v2341_v0 = vld [vmem:[#allocation8 + $0xd0] sm:$0xff] }
 0xead   :  { %v6130_v44 = vadd.f32 %v4208_v37, %v4203_v42  ;;  %5315 = vmatprep.subr.bf16.mxu1 %v5314_v51  ;;  %v5346_v41 = vpack.c.bf16 %v2332_v40, %v2331_v38  ;;  %v2334_v42 = vld [vmem:[#allocation8 + $0x98] sm:$0xff]  ;;  %v2340_v3 = vld [vmem:[#allocation8 + $0xc8] sm:$0xff]  ;;  %v5366_v1 = vpack.c.bf16 %v2342_v53, %v2341_v0 }
 0xeae   :  { %4213 = vadd.xlane.f32.xlu1 %v6128_v43  ;;  %v4218_v39 = vmul.f32 %v6128_v43, %v6128_v43  ;;  %5317 = vmatpush3.bf16.msra.mxu1 %v5314_v51  ;;  %v5350_v30 = vpack.c.bf16 %v2334_v42, %v2333_v29  ;;  %v2339_v51 = vld [vmem:[#allocation8 + $0xc0] sm:$0xff] }
 0xeaf   :  { %4211 = vadd.xlane.f32.xlu0 %v6130_v44  ;;  %v4217_v45 = vmul.f32 %v6130_v44, %v6130_v44  ;;  %5319 = vmatprep.subr.bf16.mxu1 %v5318_v52 }
 0xeb0   :  { %5347 = vmatprep.subr.bf16.mxu0 %v5346_v41 }
 0xeb1   :  { %5349 = vmatpush3.bf16.msra.mxu0 %v5346_v41 }
 0xeb2   :  { %5321 = vmatpush3.bf16.msra.mxu1 %v5318_v52  ;;  %5351 = vmatprep.subr.bf16.mxu0 %v5350_v30  ;;  %v5362_v52 = vpack.c.bf16 %v2340_v3, %v2339_v51 }
 0xeb3   :  { %4219 = vadd.xlane.f32.xlu0 %v4217_v45  ;;  %5323 = vmatprep.subr.bf16.mxu1 %v5322_v54  ;;  %v5354_v45 = vpack.c.bf16 %v2336_v35, %v2335_v34 }
 0xeb5   :  { %5353 = vmatpush3.bf16.msra.mxu0 %v5350_v30 }
 0xeb6   :  { %5325 = vmatpush3.bf16.msra.mxu1 %v5322_v54  ;;  %5355 = vmatprep.subr.bf16.mxu0 %v5354_v45  ;;  %v2343_v54 = vld [vmem:[#allocation8 + $0xe0] sm:$0xff] }
 0xeb7   :  { %4221 = vadd.xlane.f32.xlu0 %v4218_v39  ;;  %5327 = vmatprep.subr.bf16.mxu1 %v5326_v57  ;;  %v2337_v39 = vld [vmem:[#allocation8 + $0xb0] sm:$0xff]  ;;  %v5370_v56 = vpack.c.bf16 %v2344_v32, %v2343_v54 }
 0xeb8   :  { %v5358_v50 = vpack.c.bf16 %v2338_v5, %v2337_v39 }
 0xeb9   :  { %5357 = vmatpush3.bf16.msra.mxu0 %v5354_v45 }
 0xeba   :  { %5329 = vmatpush3.bf16.msra.mxu1 %v5326_v57  ;;  %5359 = vmatprep.subr.bf16.mxu0 %v5358_v50  ;;  %v2345_v57 = vld [vmem:[#allocation8 + $0xf0] sm:$0xff] }
 0xebb   :  { %5331 = vmatprep.subr.bf16.mxu1 %v5330_v58  ;;  %v5374_v11 = vpack.c.bf16 %v2346_v48, %v2345_v57 }
 0xebd   :  { %5361 = vmatpush3.bf16.msra.mxu0 %v5358_v50 }
 0xebe   :  { %5333 = vmatpush3.bf16.msra.mxu1 %v5330_v58  ;;  %5363 = vmatprep.subr.bf16.mxu0 %v5362_v52  ;;  %v4483_v58 = vld [vmem:[%s6169_s1 + $0x18] sm:$0x3]  ;;  %s5625_s1 = smov [#allocation10]  }
 0xebf   :  { %5335 = vmatprep.subr.bf16.mxu1 %v5334_v46  ;;  %v4252_v10 = vrot.slane %v4483_v58, %v5748_v31  ;;  %s4436_s12 = sshll.u32 %s5625_s1, 4  ;;  %s4437_s12 = int_to_ptr.vmem [resolvable:$true] %s4436_s12 }
 0xec0   :  { %s5581_s14 = scalar_lea.vmem %s4437_s12, 256  ;;  %p5586_p5 = scmp.lt.s32.totalorder %s4437_s12, %s4437_s12 }
 0xec1   :  { %5365 = vmatpush3.bf16.msra.mxu0 %v5362_v52  ;;  %p5582_p4 = scmp.ne.s32.totalorder %s4437_s12, %s5581_s14  ;;  %p5587_p6 = scmp.lt.s32.totalorder %s5581_s14, %s5581_s14 }
 0xec2   :  { %5337 = vmatpush3.bf16.msra.mxu1 %v5334_v46  ;;  %5367 = vmatprep.subr.bf16.mxu0 %v5366_v1 }
 0xec3   :  { %5339 = vmatprep.subr.bf16.mxu1 %v5338_v60  ;;  %p5588_p7 = por %p5587_p6, %p5586_p5 }
 0xec5   :  { %5369 = vmatpush3.bf16.msra.mxu0 %v5366_v1  ;;  %p5589_p8 = pnand %p5588_p7, %p5582_p4 }
 0xec6   :  { %5341 = vmatpush3.bf16.msra.mxu1 %v5338_v60  ;;  %5371 = vmatprep.subr.bf16.mxu0 %v5370_v56 }
 0xec7   :  { %5343 = vmatprep.subr.bf16.mxu1 %v5342_v17 }
 0xec9   :  { %5373 = vmatpush3.bf16.msra.mxu0 %v5370_v56 }
 0xeca   :  { %5345 = vmatpush3.bf16.msra.mxu1 %v5342_v17  ;;  %5375 = vmatprep.subr.bf16.mxu0 %v5374_v11 }
 0xecd   :  { %5377 = vmatpush3.bf16.msra.mxu0 %v5374_v11 }
 0xf3b   :  { %v4214_v6 = vpop.xlane.xlu1 %4213 }
 0xf3c   :  { %v4212_v63 = vpop.xlane.xlu0 %4211  ;;  %v4216_v8 = vmul.f32 0.03125, %v4214_v6 }
 0xf3d   :  { %v4215_v2 = vmul.f32 0.03125, %v4212_v63 }
 0xf3e   :  { %v4226_v14 = vmul.f32 %v4216_v8, %v4216_v8  ;;  %v4230_v24 = vsub.f32 %v6128_v43, %v4216_v8 }
 0xf3f   :  { %v4225_v9 = vmul.f32 %v4215_v2, %v4215_v2  ;;  %v4229_v20 = vsub.f32 %v6130_v44, %v4215_v2 }
 0xf40   :  { %v4220_v7 = vpop.xlane.xlu0 %4219 }
 0xf41   :  { %v4223_v49 = vmul.f32 0.03125, %v4220_v7 }
 0xf43   :  { %v4227_v4 = vsub.f32 %v4223_v49, %v4225_v9 }
 0xf44   :  { %v4222_v12 = vpop.xlane.xlu0 %4221 }
 0xf45   :  { %v4231_v15 = vadd.f32 1e-05, %v4227_v4  ;;  %v4224_v16 = vmul.f32 0.03125, %v4222_v12 }
 0xf47   :  { %5485 = vrsqrt.f32 %v4231_v15  ;;  %v4228_v18 = vsub.f32 %v4224_v16, %v4226_v14 }
 0xf49   :  { %v4232_v19 = vadd.f32 1e-05, %v4228_v18 }
 0xf4b   :  { %5487 = vrsqrt.f32 %v4232_v19  ;;  %v4426_v19 = vrot.slane %v4483_v58, %v5756_v33 }
 0xf51   :  { %v5486_v55 = vpop.eup %5485 }
 0xf52   :  { %v4235_v22 = vmul.f32 %v5486_v55, %v4229_v20 }
 0xf54   :  { %v4241_v25 = vmul.f32 %v4240_v21, %v4235_v22 }
 0xf55   :  { %v5488_v26 = vpop.eup %5487 }
 0xf56   :  { %v4247_v27 = vadd.f32 %v4246_v23, %v4241_v25  ;;  %v4236_v28 = vmul.f32 %v5488_v26, %v4230_v24 }
 0xf58   :  { %5084 = vmatprep.mubr.f32.mxu1 %v4247_v27  ;;  %v4242_v36 = vmul.f32 %v4240_v21, %v4236_v28 }
 0xf5a   :  { %v4248_v37 = vadd.f32 %v4246_v23, %v4242_v36 }
 0xf5c   :  { %5085 = vmatmul.mubr.f32.vlgmr.msra.gmra.mrb[42].mxu1 %v4248_v37 }
0x102f   :  { %v5086_v13 = vpop.f32.mrb[42].mxu1 }
0x1030   :  { %v4325_v46 = vadd.f32 %v5086_v13, %v4252_v10  ;;  %v4319_v47 = vpop.f32.mrb[43].mxu1 }
0x1031   :  { %v4320_v59 = vadd.f32 %v4319_v47, %v4252_v10 }
0x1032   :  { %v4329_v60 = vmul.f32 %v4325_v46, %v4325_v46 }
0x1033   :  { %v4328_v61 = vmul.f32 %v4320_v59, %v4320_v59 }
0x1034   :  { %v4331_v62 = vmul.f32 %v4329_v60, %v4325_v46 }
0x1035   :  { %v4330_v17 = vmul.f32 %v4328_v61, %v4320_v59 }
0x1036   :  { %v4333_v63 = vmul.f32 0.044715, %v4331_v62 }
0x1037   :  { %v4332_v2 = vmul.f32 0.044715, %v4330_v17 }
0x1038   :  { %v4335_v6 = vadd.f32 %v4333_v63, %v4325_v46 }
0x1039   :  { %v4334_v7 = vadd.f32 %v4332_v2, %v4320_v59 }
0x103a   :  { %v4337_v8 = vmul.f32 0.7978846, %v4335_v6 }
0x103b   :  { %v4336_v9 = vmul.f32 0.7978846, %v4334_v7 }
0x103c   :  { %5489 = vtanh.f32 %v4337_v8 }
0x103d   :  { %5491 = vtanh.f32 %v4336_v9 }
0x1046   :  { %v5490_v49 = vpop.eup %5489 }
0x1047   :  { %v5492_v4 = vpop.eup %5491  ;;  %v4341_v12 = vadd.f32 1.0, %v5490_v49 }
0x1048   :  { %v4340_v31 = vadd.f32 1.0, %v5492_v4 }
0x1049   :  { %v4343_v14 = vmul.f32 0.5, %v4341_v12 }
0x104a   :  { %v4342_v15 = vmul.f32 0.5, %v4340_v31 }
0x104b   :  { %v4345_v18 = vmul.f32 %v4343_v14, %v4325_v46 }
0x104c   :  { %v4344_v16 = vmul.f32 %v4342_v15, %v4320_v59 }
0x104e   :  { %5119 = vmatprep.mubr.f32.mxu0 %v4344_v16 }
0x104f   :  { %5120 = vmatmul.mubr.f32.vlgmr.msra.gmra.mrb[42].mxu0 %v4345_v18 }
0x1122   :  { %v5121_v20 = vpop.f32.mrb[42].mxu0 }
0x1123   :  { %v4422_v21 = vadd.f32 %v5121_v20, %v6128_v43  ;;  %v4412_v55 = vpop.f32.mrb[43].mxu0 }
0x1124   :  { %v4421_v22 = vadd.f32 %v4412_v55, %v6130_v44 }
0x1125   :  { %v4428_v23 = vadd.f32 %v4426_v19, %v4422_v21 }
0x1126   :  { %v4427_v24 = vadd.f32 %v4426_v19, %v4421_v22 }
0x1127   :  { %4430 = vst [vmem:[#allocation10 + $0x8] sm:$0xff] %v4428_v23 }
0x1128   :  { %4429 = vst [vmem:[#allocation10] sm:$0xff] %v4427_v24 }
0x1129   :  { %5592 = shalt.err (!%p5589_p8)
}
0x112a   :  { %s5593_s17 = scalar_lea.hbm %s6174_s6, 256 }
0x112b   :  { %p5594_p9 = scmp.ne.s32.totalorder %s6174_s6, %s5593_s17  ;;  %p5597_p10 = scmp.lt.u32.totalorder %s5593_s17, %s6174_s6 }
0x112d   :  { %p5599_p11 = pnand %p5597_p10, %p5594_p9 }
0x112f   :  { %5602 = shalt.err (!%p5599_p11)
}
0x1130   :  { %4442 = dma.vmem_to_hbm [thread:$0]  %s4437_s12, 256, %s6174_s6, [#allocation4], %s5612_s7, %s5612_s7, %s5613_s8  }
0x1131   :  { %5609 = dma.done.wait [#allocation4], 256  }
0x1132   :  { %5610 = vsyncadd [#allocation4], 4294967040 }
0x1133   :  { %4446 = vsyncpa [#allocation3], 1 }
0x1134   :  { %4447 = vsyncpa [#allocation6], 1 }
0x1135   :  { %4448 = vsyncpa [#allocation9], 1 }
0x1136   :  { %4449 = vsyncpa [#allocation4], 1 }

</bundles_post_ra>
